<compile_context>
chip_gen: v7x
topology: tpu7x:2x2x1
jax: 0.10.0
libtpu: 0.0.40
codegen_flags: <defaults>
</compile_context>

<pallas_src>
import math
from functools import partial

import jax
import jax.numpy as jnp
from jax.experimental import pallas as pl
from jax.experimental.pallas import tpu as pltpu


# ------------------------------ fused kernel --------------------------------

def _layer_norm(x, g, b, eps=1e-5):
    mu = jnp.mean(x, axis=-1, keepdims=True)
    xc = x - mu
    var = jnp.mean(xc * xc, axis=-1, keepdims=True)
    return xc * jax.lax.rsqrt(var + eps) * g + b


def _fused_reencoder_kernel(
        x_ref, bias_ref,                        # input activations / attn bias
        win_ref, bin_ref,                       # in_proj  (constant over grid)
        wqkv_ref, wo_ref, wfc1_ref, wfc2_ref,   # per-layer matrices
        vec_ref,                                # per-layer packed bias/LN slab
        wout_ref, bout_ref,                     # out_proj (constant over grid)
        o_ref,                                  # output
        x_vmem, qkv_vmem, heads_vmem, attn_vmem,  # VMEM scratch
        *, B, T, H, Dh):
    li = pl.program_id(0)
    n_layers = pl.num_programs(0)
    C = H * Dh
    F = wfc1_ref.shape[2]

    # ---- input projection: run once at layer 0, result stays resident ----
    @pl.when(li == 0)
    def _():
        x_vmem[...] = (jnp.dot(x_ref[...], win_ref[...],
                               preferred_element_type=jnp.float32)
                       + bin_ref[...])

    x = x_vmem[...]                              # (B*T, C) f32, batch-major rows

    # ---- packed per-layer vectors: biases + LayerNorm params ----
    vec = vec_ref[0]                             # (8, VLANES)
    b_qkv = vec[0:1, :3 * C]
    b_o   = vec[1:2, :C]
    ln1_g = vec[2:3, :C]
    ln1_b = vec[3:4, :C]
    b_fc1 = vec[4:5, :F]
    b_fc2 = vec[5:6, :C]
    ln2_g = vec[6:7, :C]
    ln2_b = vec[7:8, :C]

    # ---- fused QKV projection (q pre-scaled; columns head-major q|k|v) ----
    qkv_vmem[...] = (jnp.dot(x, wqkv_ref[0],
                             preferred_element_type=jnp.float32) + b_qkv)

    # ---- relayout to head-major rows: (B*H*T, 3*Dh) ----
    for b in range(B):                           # static loops; B, H tiny
        for h in range(H):
            r = (b * H + h) * T
            heads_vmem[r:r + T, :] = qkv_vmem[b * T:(b + 1) * T,
                                              h * 3 * Dh:(h + 1) * 3 * Dh]

    q_all = heads_vmem[:, 0:Dh]                  # (B*H*T, Dh), pre-scaled
    k_all = heads_vmem[:, Dh:2 * Dh]
    v_all = heads_vmem[:, 2 * Dh:3 * Dh]

    # ---- block-diagonal attention: all batches/heads in ONE matmul pair ----
    # bias_ref holds -1e9 for cross-(batch,head) blocks and padded keys.
    s = jax.lax.dot_general(q_all, k_all, (((1,), (1,)), ((), ())),
                            preferred_element_type=jnp.float32)
    s = s + bias_ref[...]
    s = s - jnp.max(s, axis=-1, keepdims=True)
    p = jnp.exp(s)
    p = p * pl.reciprocal(jnp.sum(p, axis=-1, keepdims=True), approx=True)
    ctx = jnp.dot(p, v_all, preferred_element_type=jnp.float32)   # (B*H*T, Dh)

    # ---- scatter heads back into the lane dim: (B*T, C) ----
    for b in range(B):
        for h in range(H):
            r = (b * H + h) * T
            attn_vmem[b * T:(b + 1) * T, h * Dh:(h + 1) * Dh] = ctx[r:r + T, :]

    attn = (jnp.dot(attn_vmem[...], wo_ref[0],
                    preferred_element_type=jnp.float32) + b_o)

    # ---- residual + LayerNorm (post-norm) ----
    x = _layer_norm(x + attn, ln1_g, ln1_b)

    # ---- feed-forward (relu) + residual + LayerNorm ----
    h1 = jnp.maximum(
        jnp.dot(x, wfc1_ref[0], preferred_element_type=jnp.float32) + b_fc1, 0.0)
    h2 = jnp.dot(h1, wfc2_ref[0], preferred_element_type=jnp.float32) + b_fc2
    x = _layer_norm(x + h2, ln2_g, ln2_b)

    x_vmem[...] = x

    # ---- output projection: run once at the last layer ----
    @pl.when(li == n_layers - 1)
    def _():
        o_ref[...] = (jnp.dot(x, wout_ref[...],
                              preferred_element_type=jnp.float32)
                      + bout_ref[...]).astype(o_ref.dtype)


# --------------------------- parameter setup ---------------------------------

def _init_linear(key, din, dout):
    kw, kb = jax.random.split(key)
    w = jax.random.normal(kw, (din, dout), jnp.float32) * (1.0 / math.sqrt(din))
    b = jax.random.normal(kb, (dout,), jnp.float32) * 0.01
    return w, b


def init_reencoder_params(key, encoder_embed_dim, reencoder_embed_dim,
                          num_layers, num_heads, ffn_dim):
    C = reencoder_embed_dim
    F = ffn_dim
    Dh = C // num_heads
    scaling = Dh ** -0.5
    vlanes = max(3 * C, F)
    keys = jax.random.split(key, 2 + num_layers)

    w_in, b_in = _init_linear(keys[0], encoder_embed_dim, C)
    w_out, b_out = _init_linear(keys[1], C, encoder_embed_dim)

    wqkv, wo, wfc1, wfc2, vecs = [], [], [], [], []
    for li in range(num_layers):
        lk = jax.random.split(keys[2 + li], 6)
        wq, bq = _init_linear(lk[0], C, C)
        wk, bk = _init_linear(lk[1], C, C)
        wv, bv = _init_linear(lk[2], C, C)
        w_o, b_o = _init_linear(lk[3], C, C)
        w1, b1 = _init_linear(lk[4], C, F)
        w2, b2 = _init_linear(lk[5], F, C)

        # fold attention scaling into Wq AND bq (fairseq scales q after bias);
        # order columns head-major [q_h | k_h | v_h] per head for cheap relayout.
        wcols, bcols = [], []
        for h in range(num_heads):
            sl = slice(h * Dh, (h + 1) * Dh)
            wcols += [wq[:, sl] * scaling, wk[:, sl], wv[:, sl]]
            bcols += [bq[sl] * scaling, bk[sl], bv[sl]]
        wqkv.append(jnp.concatenate(wcols, axis=1))        # (C, 3C)
        wo.append(w_o)
        wfc1.append(w1)
        wfc2.append(w2)

        vec = jnp.zeros((8, vlanes), jnp.float32)
        vec = vec.at[0, :3 * C].set(jnp.concatenate(bcols))
        vec = vec.at[1, :C].set(b_o)
        vec = vec.at[2, :C].set(jnp.ones((C,), jnp.float32))   # ln1 gamma
        vec = vec.at[3, :C].set(jnp.zeros((C,), jnp.float32))  # ln1 beta
        vec = vec.at[4, :F].set(b1)
        vec = vec.at[5, :C].set(b2)
        vec = vec.at[6, :C].set(jnp.ones((C,), jnp.float32))   # ln2 gamma
        vec = vec.at[7, :C].set(jnp.zeros((C,), jnp.float32))  # ln2 beta
        vecs.append(vec)

    stack = lambda xs: jnp.stack(xs, axis=0)
    return {
        "w_in": w_in, "b_in": b_in[None, :],
        "w_out": w_out, "b_out": b_out[None, :],
        "wqkv": stack(wqkv), "wo": stack(wo),
        "wfc1": stack(wfc1), "wfc2": stack(wfc2),
        "vec": stack(vecs),
    }


# ------------------------------- forward -------------------------------------

@partial(jax.jit, static_argnames=("num_heads",))
def reencoder_forward(params, src_tokens_prev_features, src_tokens_padding_masking,
                      *, num_heads):
    """src_tokens_prev_features: (T, B, encoder_embed_dim) float32
       src_tokens_padding_masking: (B, T) bool (True = pad)
       returns encoder_out: (T, B, encoder_embed_dim)"""
    feats = src_tokens_prev_features
    T, B, E_in = feats.shape
    L, C, _ = params["wqkv"].shape
    H = num_heads
    Dh = C // H
    F = params["wfc1"].shape[2]
    E_out = params["w_out"].shape[1]
    BT = B * T
    BHT = B * H * T
    VR, VL = params["vec"].shape[1], params["vec"].shape[2]

    # one layout change at the boundary: time-major -> batch-major rows
    x2d = feats.transpose(1, 0, 2).reshape(BT, E_in)

    # Precompute the block-diagonal additive attention bias (same every layer):
    # row = (b, h, q), col = (b', h', k). Valid only if (b', h') == (b, h);
    # valid columns add the key-padding bias, invalid ones get -1e9.
    neg = jnp.float32(-1e9)
    block_ok = jnp.kron(jnp.eye(B * H, dtype=jnp.float32),
                        jnp.ones((T, T), jnp.float32))           # (BHT, BHT)
    key_bias = jnp.where(src_tokens_padding_masking, neg, 0.0).astype(jnp.float32)
    key_bias_cols = jnp.repeat(key_bias, H, axis=0).reshape(BHT)  # (BHT,)
    bias_all = jnp.where(block_ok > 0, key_bias_cols[None, :], neg)

    const = lambda shape: pl.BlockSpec(shape, lambda l: (0, 0))
    per_layer = lambda shape: pl.BlockSpec((1,) + shape, lambda l: (l, 0, 0))

    kernel = partial(_fused_reencoder_kernel, B=B, T=T, H=H, Dh=Dh)

    out2d = pl.pallas_call(
        kernel,
        out_shape=jax.ShapeDtypeStruct((BT, E_out), feats.dtype),
        grid_spec=pltpu.PrefetchScalarGridSpec(
            num_scalar_prefetch=0,
            grid=(L,),
            in_specs=[
                const((BT, E_in)),           # x (only used at layer 0)
                const((BHT, BHT)),           # block-diag + padding attn bias
                const((E_in, C)),            # w_in
                const((1, C)),               # b_in
                per_layer((C, 3 * C)),       # wqkv (head-major, q pre-scaled)
                per_layer((C, C)),           # wo
                per_layer((C, F)),           # wfc1
                per_layer((F, C)),           # wfc2
                per_layer((VR, VL)),         # packed biases / LN params
                const((C, E_out)),           # w_out
                const((1, E_out)),           # b_out
            ],
            out_specs=pl.BlockSpec((BT, E_out), lambda l: (0, 0)),
            scratch_shapes=[
                pltpu.VMEM((BT, C), jnp.float32),          # resident activation
                pltpu.VMEM((BT, 3 * C), jnp.float32),      # fused QKV buffer
                pltpu.VMEM((BHT, 3 * Dh), jnp.float32),    # head-major q|k|v rows
                pltpu.VMEM((BT, C), jnp.float32),          # attention output
            ],
        ),
        compiler_params=pltpu.CompilerParams(
            dimension_semantics=("arbitrary",),            # layers are sequential
        ),
    )(x2d, bias_all,
      params["w_in"], params["b_in"],
      params["wqkv"], params["wo"], params["wfc1"], params["wfc2"],
      params["vec"],
      params["w_out"], params["b_out"])

    # back to fairseq time-major layout
    return out2d.reshape(B, T, E_out).transpose(1, 0, 2)


# --------------------------------- main ---------------------------------------

if __name__ == "__main__":
    # Small config implied by the module's __init__ / args
    T = 8                       # src_len
    B = 2                       # batch
    encoder_embed_dim = 32
    reencoder_embed_dim = 64
    reencoder_layers = 2
    num_heads = 4
    ffn_dim = 128

    key = jax.random.PRNGKey(0)
    k_params, k_x = jax.random.split(key)

    params = init_reencoder_params(
        k_params, encoder_embed_dim, reencoder_embed_dim,
        reencoder_layers, num_heads, ffn_dim)

    # src_tokens_prev_features: (T, B, encoder_embed_dim), fairseq time-major
    src_prev_features = jax.random.normal(k_x, (T, B, encoder_embed_dim), jnp.float32)

    # padding mask (B, T): True = padding. Lengths = [8, 6].
    lengths = jnp.array([8, 6], dtype=jnp.int32)
    positions = jnp.arange(T)[None, :]
    padding_mask = positions >= lengths[:, None]       # (B, T) bool

    encoder_out = reencoder_forward(params, src_prev_features, padding_mask,
                                    num_heads=num_heads)
    encoder_out = jax.block_until_ready(encoder_out)

    assert encoder_out.shape == (T, B, encoder_embed_dim)
    assert bool(jnp.all(jnp.isfinite(encoder_out)))

    # Output dict mirrors the PyTorch module's return structure.
    result = {
        "encoder_out": [encoder_out],
        "encoder_padding_mask": [padding_mask],
        "encoder_embedding": [],
        "encoder_states": [],
        "src_tokens": [],
        "src_lengths": [],
    }
    del result

    print("KERNEL_OK")
</pallas_src>

<mosaic_0001>
module attributes {stable_mosaic.version = 11 : i64} {
  func.func @_fused_reencoder_kernel(%arg0: i32, %arg1: memref<16x32xf32, #tpu.memory_space<vmem>>, %arg2: memref<64x64xf32, #tpu.memory_space<vmem>>, %arg3: memref<32x64xf32, #tpu.memory_space<vmem>>, %arg4: memref<1x64xf32, #tpu.memory_space<vmem>>, %arg5: memref<1x64x192xf32, #tpu.memory_space<vmem>>, %arg6: memref<1x64x64xf32, #tpu.memory_space<vmem>>, %arg7: memref<1x64x128xf32, #tpu.memory_space<vmem>>, %arg8: memref<1x128x64xf32, #tpu.memory_space<vmem>>, %arg9: memref<1x8x192xf32, #tpu.memory_space<vmem>>, %arg10: memref<64x32xf32, #tpu.memory_space<vmem>>, %arg11: memref<1x32xf32, #tpu.memory_space<vmem>>, %arg12: memref<16x32xf32, #tpu.memory_space<vmem>>, %arg13: memref<16x64xf32, #tpu.memory_space<vmem>>, %arg14: memref<16x192xf32, #tpu.memory_space<vmem>>, %arg15: memref<64x48xf32, #tpu.memory_space<vmem>>, %arg16: memref<16x64xf32, #tpu.memory_space<vmem>>) attributes {dimension_semantics = [#tpu.dimension_semantics<arbitrary>], iteration_bounds = array<i64: 2>, scalar_prefetch = 0 : i64, scratch_operands = 4 : i64, tpu.core_type = #tpu.core_type<tc>, window_params = [{pipeline_mode = #tpu.pipeline_mode<synchronous>, transform_indices = @transform_0, window_bounds = array<i64: 16, 32>}, {pipeline_mode = #tpu.pipeline_mode<synchronous>, transform_indices = @transform_1, window_bounds = array<i64: 64, 64>}, {pipeline_mode = #tpu.pipeline_mode<synchronous>, transform_indices = @transform_2, window_bounds = array<i64: 32, 64>}, {pipeline_mode = #tpu.pipeline_mode<synchronous>, transform_indices = @transform_3, window_bounds = array<i64: 1, 64>}, {transform_indices = @transform_4, window_bounds = array<i64: 1, 64, 192>}, {transform_indices = @transform_5, window_bounds = array<i64: 1, 64, 64>}, {transform_indices = @transform_6, window_bounds = array<i64: 1, 64, 128>}, {transform_indices = @transform_7, window_bounds = array<i64: 1, 128, 64>}, {transform_indices = @transform_8, window_bounds = array<i64: 1, 8, 192>}, {pipeline_mode = #tpu.pipeline_mode<synchronous>, transform_indices = @transform_9, window_bounds = array<i64: 64, 32>}, {pipeline_mode = #tpu.pipeline_mode<synchronous>, transform_indices = @transform_10, window_bounds = array<i64: 1, 32>}, {pipeline_mode = #tpu.pipeline_mode<synchronous>, transform_indices = @transform_11, window_bounds = array<i64: 16, 32>}]} {
    %c0_i32 = arith.constant 0 : i32
    %0 = arith.cmpi eq, %arg0, %c0_i32 : i32
    %1 = arith.extui %0 : i1 to i32
    %c0_i32_0 = arith.constant 0 : i32
    %2 = arith.cmpi ne, %1, %c0_i32_0 : i32
    scf.if %2 {
      %c0_89 = arith.constant 0 : index
      %c0_90 = arith.constant 0 : index
      %133 = vector.load %arg1[%c0_89, %c0_90] : memref<16x32xf32, #tpu.memory_space<vmem>>, vector<16x32xf32>
      %c0_91 = arith.constant 0 : index
      %c0_92 = arith.constant 0 : index
      %134 = vector.load %arg3[%c0_91, %c0_92] : memref<32x64xf32, #tpu.memory_space<vmem>>, vector<32x64xf32>
      %cst_93 = arith.constant dense<0.000000e+00> : vector<16x64xf32>
      %135 = tpu.matmul %133, %134, %cst_93 {dimension_numbers = #tpu.dot_dimension_numbers<[1], [0], [0], [1], [0, 0, 1, 1], [], []>} : vector<16x32xf32>, vector<32x64xf32>, vector<16x64xf32> -> vector<16x64xf32>
      %c0_94 = arith.constant 0 : index
      %c0_95 = arith.constant 0 : index
      %136 = vector.load %arg4[%c0_94, %c0_95] : memref<1x64xf32, #tpu.memory_space<vmem>>, vector<1x64xf32>
      %137 = vector.broadcast %136 : vector<1x64xf32> to vector<16x64xf32>
      %138 = arith.addf %135, %137 : vector<16x64xf32>
      %c0_96 = arith.constant 0 : index
      %c0_97 = arith.constant 0 : index
      %139 = vector.load %arg13[%c0_96, %c0_97] : memref<16x64xf32, #tpu.memory_space<vmem>>, vector<16x64xf32>
      tpu.vector_store %arg13[%c0_96, %c0_97], %138 {strides = array<i32>} : memref<16x64xf32, #tpu.memory_space<vmem>>, vector<16x64xf32>,
    } else {
    }
    %c0 = arith.constant 0 : index
    %c0_1 = arith.constant 0 : index
    %3 = vector.load %arg13[%c0, %c0_1] : memref<16x64xf32, #tpu.memory_space<vmem>>, vector<16x64xf32>
    %c0_2 = arith.constant 0 : index
    %c0_3 = arith.constant 0 : index
    %c0_4 = arith.constant 0 : index
    %4 = vector.load %arg9[%c0_2, %c0_3, %c0_4] : memref<1x8x192xf32, #tpu.memory_space<vmem>>, vector<1x8x192xf32>
    %5 = vector.shape_cast %4 : vector<1x8x192xf32> to vector<8x192xf32>
    %6 = vector.extract_strided_slice %5 {offsets = [0, 0], sizes = [1, 192], strides = [1, 1]} : vector<8x192xf32> to vector<1x192xf32>
    %7 = vector.extract_strided_slice %5 {offsets = [1, 0], sizes = [1, 64], strides = [1, 1]} : vector<8x192xf32> to vector<1x64xf32>
    %8 = vector.extract_strided_slice %5 {offsets = [2, 0], sizes = [1, 64], strides = [1, 1]} : vector<8x192xf32> to vector<1x64xf32>
    %9 = vector.extract_strided_slice %5 {offsets = [3, 0], sizes = [1, 64], strides = [1, 1]} : vector<8x192xf32> to vector<1x64xf32>
    %10 = vector.extract_strided_slice %5 {offsets = [4, 0], sizes = [1, 128], strides = [1, 1]} : vector<8x192xf32> to vector<1x128xf32>
    %11 = vector.extract_strided_slice %5 {offsets = [5, 0], sizes = [1, 64], strides = [1, 1]} : vector<8x192xf32> to vector<1x64xf32>
    %12 = vector.extract_strided_slice %5 {offsets = [6, 0], sizes = [1, 64], strides = [1, 1]} : vector<8x192xf32> to vector<1x64xf32>
    %13 = vector.extract_strided_slice %5 {offsets = [7, 0], sizes = [1, 64], strides = [1, 1]} : vector<8x192xf32> to vector<1x64xf32>
    %c0_5 = arith.constant 0 : index
    %c0_6 = arith.constant 0 : index
    %c0_7 = arith.constant 0 : index
    %14 = vector.load %arg5[%c0_5, %c0_6, %c0_7] : memref<1x64x192xf32, #tpu.memory_space<vmem>>, vector<1x64x192xf32>
    %15 = vector.shape_cast %14 : vector<1x64x192xf32> to vector<64x192xf32>
    %cst = arith.constant dense<0.000000e+00> : vector<16x192xf32>
    %16 = tpu.matmul %3, %15, %cst {dimension_numbers = #tpu.dot_dimension_numbers<[1], [0], [0], [1], [0, 0, 1, 1], [], []>} : vector<16x64xf32>, vector<64x192xf32>, vector<16x192xf32> -> vector<16x192xf32>
    %17 = vector.broadcast %6 : vector<1x192xf32> to vector<16x192xf32>
    %18 = arith.addf %16, %17 : vector<16x192xf32>
    %c0_8 = arith.constant 0 : index
    %c0_9 = arith.constant 0 : index
    %19 = vector.load %arg14[%c0_8, %c0_9] : memref<16x192xf32, #tpu.memory_space<vmem>>, vector<16x192xf32>
    tpu.vector_store %arg14[%c0_8, %c0_9], %18 {strides = array<i32>} : memref<16x192xf32, #tpu.memory_space<vmem>>, vector<16x192xf32>,
    %c0_10 = arith.constant 0 : index
    %c0_11 = arith.constant 0 : index
    %20 = vector.load %arg14[%c0_10, %c0_11] : memref<16x192xf32, #tpu.memory_space<vmem>>, vector<8x48xf32>
    %c0_12 = arith.constant 0 : index
    %c0_13 = arith.constant 0 : index
    %21 = vector.load %arg15[%c0_12, %c0_13] : memref<64x48xf32, #tpu.memory_space<vmem>>, vector<8x48xf32>
    tpu.vector_store %arg15[%c0_12, %c0_13], %20 {strides = array<i32>} : memref<64x48xf32, #tpu.memory_space<vmem>>, vector<8x48xf32>,
    %c0_14 = arith.constant 0 : index
    %c48 = arith.constant 48 : index
    %22 = vector.load %arg14[%c0_14, %c48] : memref<16x192xf32, #tpu.memory_space<vmem>>, vector<8x48xf32>
    %c8 = arith.constant 8 : index
    %c0_15 = arith.constant 0 : index
    %23 = vector.load %arg15[%c8, %c0_15] : memref<64x48xf32, #tpu.memory_space<vmem>>, vector<8x48xf32>
    tpu.vector_store %arg15[%c8, %c0_15], %22 {strides = array<i32>} : memref<64x48xf32, #tpu.memory_space<vmem>>, vector<8x48xf32>,
    %c0_16 = arith.constant 0 : index
    %c96 = arith.constant 96 : index
    %24 = vector.load %arg14[%c0_16, %c96] : memref<16x192xf32, #tpu.memory_space<vmem>>, vector<8x48xf32>
    %c16 = arith.constant 16 : index
    %c0_17 = arith.constant 0 : index
    %25 = vector.load %arg15[%c16, %c0_17] : memref<64x48xf32, #tpu.memory_space<vmem>>, vector<8x48xf32>
    tpu.vector_store %arg15[%c16, %c0_17], %24 {strides = array<i32>} : memref<64x48xf32, #tpu.memory_space<vmem>>, vector<8x48xf32>,
    %c0_18 = arith.constant 0 : index
    %c144 = arith.constant 144 : index
    %26 = vector.load %arg14[%c0_18, %c144] : memref<16x192xf32, #tpu.memory_space<vmem>>, vector<8x48xf32>
    %c24 = arith.constant 24 : index
    %c0_19 = arith.constant 0 : index
    %27 = vector.load %arg15[%c24, %c0_19] : memref<64x48xf32, #tpu.memory_space<vmem>>, vector<8x48xf32>
    tpu.vector_store %arg15[%c24, %c0_19], %26 {strides = array<i32>} : memref<64x48xf32, #tpu.memory_space<vmem>>, vector<8x48xf32>,
    %c8_20 = arith.constant 8 : index
    %c0_21 = arith.constant 0 : index
    %28 = vector.load %arg14[%c8_20, %c0_21] : memref<16x192xf32, #tpu.memory_space<vmem>>, vector<8x48xf32>
    %c32 = arith.constant 32 : index
    %c0_22 = arith.constant 0 : index
    %29 = vector.load %arg15[%c32, %c0_22] : memref<64x48xf32, #tpu.memory_space<vmem>>, vector<8x48xf32>
    tpu.vector_store %arg15[%c32, %c0_22], %28 {strides = array<i32>} : memref<64x48xf32, #tpu.memory_space<vmem>>, vector<8x48xf32>,
    %c8_23 = arith.constant 8 : index
    %c48_24 = arith.constant 48 : index
    %30 = vector.load %arg14[%c8_23, %c48_24] : memref<16x192xf32, #tpu.memory_space<vmem>>, vector<8x48xf32>
    %c40 = arith.constant 40 : index
    %c0_25 = arith.constant 0 : index
    %31 = vector.load %arg15[%c40, %c0_25] : memref<64x48xf32, #tpu.memory_space<vmem>>, vector<8x48xf32>
    tpu.vector_store %arg15[%c40, %c0_25], %30 {strides = array<i32>} : memref<64x48xf32, #tpu.memory_space<vmem>>, vector<8x48xf32>,
    %c8_26 = arith.constant 8 : index
    %c96_27 = arith.constant 96 : index
    %32 = vector.load %arg14[%c8_26, %c96_27] : memref<16x192xf32, #tpu.memory_space<vmem>>, vector<8x48xf32>
    %c48_28 = arith.constant 48 : index
    %c0_29 = arith.constant 0 : index
    %33 = vector.load %arg15[%c48_28, %c0_29] : memref<64x48xf32, #tpu.memory_space<vmem>>, vector<8x48xf32>
    tpu.vector_store %arg15[%c48_28, %c0_29], %32 {strides = array<i32>} : memref<64x48xf32, #tpu.memory_space<vmem>>, vector<8x48xf32>,
    %c8_30 = arith.constant 8 : index
    %c144_31 = arith.constant 144 : index
    %34 = vector.load %arg14[%c8_30, %c144_31] : memref<16x192xf32, #tpu.memory_space<vmem>>, vector<8x48xf32>
    %c56 = arith.constant 56 : index
    %c0_32 = arith.constant 0 : index
    %35 = vector.load %arg15[%c56, %c0_32] : memref<64x48xf32, #tpu.memory_space<vmem>>, vector<8x48xf32>
    tpu.vector_store %arg15[%c56, %c0_32], %34 {strides = array<i32>} : memref<64x48xf32, #tpu.memory_space<vmem>>, vector<8x48xf32>,
    %c0_33 = arith.constant 0 : index
    %c0_34 = arith.constant 0 : index
    %36 = vector.load %arg15[%c0_33, %c0_34] : memref<64x48xf32, #tpu.memory_space<vmem>>, vector<64x16xf32>
    %c0_35 = arith.constant 0 : index
    %c16_36 = arith.constant 16 : index
    %37 = vector.load %arg15[%c0_35, %c16_36] : memref<64x48xf32, #tpu.memory_space<vmem>>, vector<64x16xf32>
    %c0_37 = arith.constant 0 : index
    %c32_38 = arith.constant 32 : index
    %38 = vector.load %arg15[%c0_37, %c32_38] : memref<64x48xf32, #tpu.memory_space<vmem>>, vector<64x16xf32>
    %cst_39 = arith.constant dense<0.000000e+00> : vector<64x64xf32>
    %39 = tpu.matmul %36, %37, %cst_39 {dimension_numbers = #tpu.dot_dimension_numbers<[1], [1], [0], [0], [0, 0, 1, 0], [], []>} : vector<64x16xf32>, vector<64x16xf32>, vector<64x64xf32> -> vector<64x64xf32>
    %c0_40 = arith.constant 0 : index
    %c0_41 = arith.constant 0 : index
    %40 = vector.load %arg2[%c0_40, %c0_41] : memref<64x64xf32, #tpu.memory_space<vmem>>, vector<64x64xf32>
    %41 = arith.addf %39, %40 : vector<64x64xf32>
    %cst_42 = arith.constant dense<0xFF800000> : vector<64xf32>
    %42 = vector.multi_reduction <maximumf>, %41, %cst_42 [1] : vector<64x64xf32> to vector<64xf32>
    %43 = vector.shape_cast %42 : vector<64xf32> to vector<64x1xf32>
    %44 = vector.broadcast %43 : vector<64x1xf32> to vector<64x64xf32>
    %45 = arith.subf %41, %44 : vector<64x64xf32>
    %46 = math.exp %45 : vector<64x64xf32>
    %cst_43 = arith.constant dense<0.000000e+00> : vector<64xf32>
    %47 = vector.multi_reduction <add>, %46, %cst_43 [1] : vector<64x64xf32> to vector<64xf32>
    %48 = vector.shape_cast %47 : vector<64xf32> to vector<64x1xf32>
    %49 = tpu.reciprocal %48 {approx = true} : vector<64x1xf32> -> vector<64x1xf32>
    %50 = vector.broadcast %49 : vector<64x1xf32> to vector<64x64xf32>
    %51 = arith.mulf %46, %50 : vector<64x64xf32>
    %cst_44 = arith.constant dense<0.000000e+00> : vector<64x16xf32>
    %52 = tpu.matmul %51, %38, %cst_44 {dimension_numbers = #tpu.dot_dimension_numbers<[1], [0], [0], [1], [0, 0, 1, 1], [], []>} : vector<64x64xf32>, vector<64x16xf32>, vector<64x16xf32> -> vector<64x16xf32>
    %53 = vector.extract_strided_slice %52 {offsets = [0, 0], sizes = [8, 16], strides = [1, 1]} : vector<64x16xf32> to vector<8x16xf32>
    %c0_45 = arith.constant 0 : index
    %c0_46 = arith.constant 0 : index
    %54 = vector.load %arg16[%c0_45, %c0_46] : memref<16x64xf32, #tpu.memory_space<vmem>>, vector<8x16xf32>
    tpu.vector_store %arg16[%c0_45, %c0_46], %53 {strides = array<i32>} : memref<16x64xf32, #tpu.memory_space<vmem>>, vector<8x16xf32>,
    %55 = vector.extract_strided_slice %52 {offsets = [8, 0], sizes = [8, 16], strides = [1, 1]} : vector<64x16xf32> to vector<8x16xf32>
    %c0_47 = arith.constant 0 : index
    %c16_48 = arith.constant 16 : index
    %56 = vector.load %arg16[%c0_47, %c16_48] : memref<16x64xf32, #tpu.memory_space<vmem>>, vector<8x16xf32>
    tpu.vector_store %arg16[%c0_47, %c16_48], %55 {strides = array<i32>} : memref<16x64xf32, #tpu.memory_space<vmem>>, vector<8x16xf32>,
    %57 = vector.extract_strided_slice %52 {offsets = [16, 0], sizes = [8, 16], strides = [1, 1]} : vector<64x16xf32> to vector<8x16xf32>
    %c0_49 = arith.constant 0 : index
    %c32_50 = arith.constant 32 : index
    %58 = vector.load %arg16[%c0_49, %c32_50] : memref<16x64xf32, #tpu.memory_space<vmem>>, vector<8x16xf32>
    tpu.vector_store %arg16[%c0_49, %c32_50], %57 {strides = array<i32>} : memref<16x64xf32, #tpu.memory_space<vmem>>, vector<8x16xf32>,
    %59 = vector.extract_strided_slice %52 {offsets = [24, 0], sizes = [8, 16], strides = [1, 1]} : vector<64x16xf32> to vector<8x16xf32>
    %c0_51 = arith.constant 0 : index
    %c48_52 = arith.constant 48 : index
    %60 = vector.load %arg16[%c0_51, %c48_52] : memref<16x64xf32, #tpu.memory_space<vmem>>, vector<8x16xf32>
    tpu.vector_store %arg16[%c0_51, %c48_52], %59 {strides = array<i32>} : memref<16x64xf32, #tpu.memory_space<vmem>>, vector<8x16xf32>,
    %61 = vector.extract_strided_slice %52 {offsets = [32, 0], sizes = [8, 16], strides = [1, 1]} : vector<64x16xf32> to vector<8x16xf32>
    %c8_53 = arith.constant 8 : index
    %c0_54 = arith.constant 0 : index
    %62 = vector.load %arg16[%c8_53, %c0_54] : memref<16x64xf32, #tpu.memory_space<vmem>>, vector<8x16xf32>
    tpu.vector_store %arg16[%c8_53, %c0_54], %61 {strides = array<i32>} : memref<16x64xf32, #tpu.memory_space<vmem>>, vector<8x16xf32>,
    %63 = vector.extract_strided_slice %52 {offsets = [40, 0], sizes = [8, 16], strides = [1, 1]} : vector<64x16xf32> to vector<8x16xf32>
    %c8_55 = arith.constant 8 : index
    %c16_56 = arith.constant 16 : index
    %64 = vector.load %arg16[%c8_55, %c16_56] : memref<16x64xf32, #tpu.memory_space<vmem>>, vector<8x16xf32>
    tpu.vector_store %arg16[%c8_55, %c16_56], %63 {strides = array<i32>} : memref<16x64xf32, #tpu.memory_space<vmem>>, vector<8x16xf32>,
    %65 = vector.extract_strided_slice %52 {offsets = [48, 0], sizes = [8, 16], strides = [1, 1]} : vector<64x16xf32> to vector<8x16xf32>
    %c8_57 = arith.constant 8 : index
    %c32_58 = arith.constant 32 : index
    %66 = vector.load %arg16[%c8_57, %c32_58] : memref<16x64xf32, #tpu.memory_space<vmem>>, vector<8x16xf32>
    tpu.vector_store %arg16[%c8_57, %c32_58], %65 {strides = array<i32>} : memref<16x64xf32, #tpu.memory_space<vmem>>, vector<8x16xf32>,
    %67 = vector.extract_strided_slice %52 {offsets = [56, 0], sizes = [8, 16], strides = [1, 1]} : vector<64x16xf32> to vector<8x16xf32>
    %c8_59 = arith.constant 8 : index
    %c48_60 = arith.constant 48 : index
    %68 = vector.load %arg16[%c8_59, %c48_60] : memref<16x64xf32, #tpu.memory_space<vmem>>, vector<8x16xf32>
    tpu.vector_store %arg16[%c8_59, %c48_60], %67 {strides = array<i32>} : memref<16x64xf32, #tpu.memory_space<vmem>>, vector<8x16xf32>,
    %c0_61 = arith.constant 0 : index
    %c0_62 = arith.constant 0 : index
    %69 = vector.load %arg16[%c0_61, %c0_62] : memref<16x64xf32, #tpu.memory_space<vmem>>, vector<16x64xf32>
    %c0_63 = arith.constant 0 : index
    %c0_64 = arith.constant 0 : index
    %c0_65 = arith.constant 0 : index
    %70 = vector.load %arg6[%c0_63, %c0_64, %c0_65] : memref<1x64x64xf32, #tpu.memory_space<vmem>>, vector<1x64x64xf32>
    %71 = vector.shape_cast %70 : vector<1x64x64xf32> to vector<64x64xf32>
    %cst_66 = arith.constant dense<0.000000e+00> : vector<16x64xf32>
    %72 = tpu.matmul %69, %71, %cst_66 {dimension_numbers = #tpu.dot_dimension_numbers<[1], [0], [0], [1], [0, 0, 1, 1], [], []>} : vector<16x64xf32>, vector<64x64xf32>, vector<16x64xf32> -> vector<16x64xf32>
    %73 = vector.broadcast %7 : vector<1x64xf32> to vector<16x64xf32>
    %74 = arith.addf %72, %73 : vector<16x64xf32>
    %75 = arith.addf %3, %74 : vector<16x64xf32>
    %cst_67 = arith.constant dense<0.000000e+00> : vector<16xf32>
    %76 = vector.multi_reduction <add>, %75, %cst_67 [1] : vector<16x64xf32> to vector<16xf32>
    %77 = vector.shape_cast %76 : vector<16xf32> to vector<16x1xf32>
    %cst_68 = arith.constant 6.400000e+01 : f32
    %78 = vector.broadcast %cst_68 : f32 to vector<16x1xf32>
    %79 = arith.divf %77, %78 : vector<16x1xf32>
    %80 = vector.broadcast %79 : vector<16x1xf32> to vector<16x64xf32>
    %81 = arith.subf %75, %80 : vector<16x64xf32>
    %82 = arith.mulf %81, %81 : vector<16x64xf32>
    %cst_69 = arith.constant dense<0.000000e+00> : vector<16xf32>
    %83 = vector.multi_reduction <add>, %82, %cst_69 [1] : vector<16x64xf32> to vector<16xf32>
    %84 = vector.shape_cast %83 : vector<16xf32> to vector<16x1xf32>
    %cst_70 = arith.constant 6.400000e+01 : f32
    %85 = vector.broadcast %cst_70 : f32 to vector<16x1xf32>
    %86 = arith.divf %84, %85 : vector<16x1xf32>
    %cst_71 = arith.constant 9.99999974E-6 : f32
    %87 = vector.broadcast %cst_71 : f32 to vector<16x1xf32>
    %88 = arith.addf %86, %87 : vector<16x1xf32>
    %89 = math.rsqrt %88 : vector<16x1xf32>
    %90 = vector.broadcast %89 : vector<16x1xf32> to vector<16x64xf32>
    %91 = arith.mulf %81, %90 : vector<16x64xf32>
    %92 = vector.broadcast %8 : vector<1x64xf32> to vector<16x64xf32>
    %93 = arith.mulf %91, %92 : vector<16x64xf32>
    %94 = vector.broadcast %9 : vector<1x64xf32> to vector<16x64xf32>
    %95 = arith.addf %93, %94 : vector<16x64xf32>
    %c0_72 = arith.constant 0 : index
    %c0_73 = arith.constant 0 : index
    %c0_74 = arith.constant 0 : index
    %96 = vector.load %arg7[%c0_72, %c0_73, %c0_74] : memref<1x64x128xf32, #tpu.memory_space<vmem>>, vector<1x64x128xf32>
    %97 = vector.shape_cast %96 : vector<1x64x128xf32> to vector<64x128xf32>
    %cst_75 = arith.constant dense<0.000000e+00> : vector<16x128xf32>
    %98 = tpu.matmul %95, %97, %cst_75 {dimension_numbers = #tpu.dot_dimension_numbers<[1], [0], [0], [1], [0, 0, 1, 1], [], []>} : vector<16x64xf32>, vector<64x128xf32>, vector<16x128xf32> -> vector<16x128xf32>
    %99 = vector.broadcast %10 : vector<1x128xf32> to vector<16x128xf32>
    %100 = arith.addf %98, %99 : vector<16x128xf32>
    %cst_76 = arith.constant 0.000000e+00 : f32
    %101 = vector.broadcast %cst_76 : f32 to vector<16x128xf32>
    %102 = arith.maximumf %100, %101 : vector<16x128xf32>
    %c0_77 = arith.constant 0 : index
    %c0_78 = arith.constant 0 : index
    %c0_79 = arith.constant 0 : index
    %103 = vector.load %arg8[%c0_77, %c0_78, %c0_79] : memref<1x128x64xf32, #tpu.memory_space<vmem>>, vector<1x128x64xf32>
    %104 = vector.shape_cast %103 : vector<1x128x64xf32> to vector<128x64xf32>
    %cst_80 = arith.constant dense<0.000000e+00> : vector<16x64xf32>
    %105 = tpu.matmul %102, %104, %cst_80 {dimension_numbers = #tpu.dot_dimension_numbers<[1], [0], [0], [1], [0, 0, 1, 1], [], []>} : vector<16x128xf32>, vector<128x64xf32>, vector<16x64xf32> -> vector<16x64xf32>
    %106 = vector.broadcast %11 : vector<1x64xf32> to vector<16x64xf32>
    %107 = arith.addf %105, %106 : vector<16x64xf32>
    %108 = arith.addf %95, %107 : vector<16x64xf32>
    %cst_81 = arith.constant dense<0.000000e+00> : vector<16xf32>
    %109 = vector.multi_reduction <add>, %108, %cst_81 [1] : vector<16x64xf32> to vector<16xf32>
    %110 = vector.shape_cast %109 : vector<16xf32> to vector<16x1xf32>
    %cst_82 = arith.constant 6.400000e+01 : f32
    %111 = vector.broadcast %cst_82 : f32 to vector<16x1xf32>
    %112 = arith.divf %110, %111 : vector<16x1xf32>
    %113 = vector.broadcast %112 : vector<16x1xf32> to vector<16x64xf32>
    %114 = arith.subf %108, %113 : vector<16x64xf32>
    %115 = arith.mulf %114, %114 : vector<16x64xf32>
    %cst_83 = arith.constant dense<0.000000e+00> : vector<16xf32>
    %116 = vector.multi_reduction <add>, %115, %cst_83 [1] : vector<16x64xf32> to vector<16xf32>
    %117 = vector.shape_cast %116 : vector<16xf32> to vector<16x1xf32>
    %cst_84 = arith.constant 6.400000e+01 : f32
    %118 = vector.broadcast %cst_84 : f32 to vector<16x1xf32>
    %119 = arith.divf %117, %118 : vector<16x1xf32>
    %cst_85 = arith.constant 9.99999974E-6 : f32
    %120 = vector.broadcast %cst_85 : f32 to vector<16x1xf32>
    %121 = arith.addf %119, %120 : vector<16x1xf32>
    %122 = math.rsqrt %121 : vector<16x1xf32>
    %123 = vector.broadcast %122 : vector<16x1xf32> to vector<16x64xf32>
    %124 = arith.mulf %114, %123 : vector<16x64xf32>
    %125 = vector.broadcast %12 : vector<1x64xf32> to vector<16x64xf32>
    %126 = arith.mulf %124, %125 : vector<16x64xf32>
    %127 = vector.broadcast %13 : vector<1x64xf32> to vector<16x64xf32>
    %128 = arith.addf %126, %127 : vector<16x64xf32>
    %c0_86 = arith.constant 0 : index
    %c0_87 = arith.constant 0 : index
    %129 = vector.load %arg13[%c0_86, %c0_87] : memref<16x64xf32, #tpu.memory_space<vmem>>, vector<16x64xf32>
    tpu.vector_store %arg13[%c0_86, %c0_87], %128 {strides = array<i32>} : memref<16x64xf32, #tpu.memory_space<vmem>>, vector<16x64xf32>,
    %c1_i32 = arith.constant 1 : i32
    %130 = arith.cmpi eq, %arg0, %c1_i32 : i32
    %131 = arith.extui %130 : i1 to i32
    %c0_i32_88 = arith.constant 0 : i32
    %132 = arith.cmpi ne, %131, %c0_i32_88 : i32
    scf.if %132 {
      %c0_89 = arith.constant 0 : index
      %c0_90 = arith.constant 0 : index
      %133 = vector.load %arg10[%c0_89, %c0_90] : memref<64x32xf32, #tpu.memory_space<vmem>>, vector<64x32xf32>
      %cst_91 = arith.constant dense<0.000000e+00> : vector<16x32xf32>
      %134 = tpu.matmul %128, %133, %cst_91 {dimension_numbers = #tpu.dot_dimension_numbers<[1], [0], [0], [1], [0, 0, 1, 1], [], []>} : vector<16x64xf32>, vector<64x32xf32>, vector<16x32xf32> -> vector<16x32xf32>
      %c0_92 = arith.constant 0 : index
      %c0_93 = arith.constant 0 : index
      %135 = vector.load %arg11[%c0_92, %c0_93] : memref<1x32xf32, #tpu.memory_space<vmem>>, vector<1x32xf32>
      %136 = vector.broadcast %135 : vector<1x32xf32> to vector<16x32xf32>
      %137 = arith.addf %134, %136 : vector<16x32xf32>
      %c0_94 = arith.constant 0 : index
      %c0_95 = arith.constant 0 : index
      %138 = vector.load %arg12[%c0_94, %c0_95] : memref<16x32xf32, #tpu.memory_space<vmem>>, vector<16x32xf32>
      tpu.vector_store %arg12[%c0_94, %c0_95], %137 {strides = array<i32>} : memref<16x32xf32, #tpu.memory_space<vmem>>, vector<16x32xf32>,
    } else {
    }
    return
  }
  func.func @transform_0(%arg0: i32) -> (i32, i32) {
    %c0_i32 = arith.constant 0 : i32
    %c0_i32_0 = arith.constant 0 : i32
    %c0_i32_1 = arith.constant 0 : i32
    return %c0_i32, %c0_i32_0 : i32, i32
  }
  func.func @transform_1(%arg0: i32) -> (i32, i32) {
    %c0_i32 = arith.constant 0 : i32
    %c0_i32_0 = arith.constant 0 : i32
    %c0_i32_1 = arith.constant 0 : i32
    return %c0_i32, %c0_i32_0 : i32, i32
  }
  func.func @transform_2(%arg0: i32) -> (i32, i32) {
    %c0_i32 = arith.constant 0 : i32
    %c0_i32_0 = arith.constant 0 : i32
    %c0_i32_1 = arith.constant 0 : i32
    return %c0_i32, %c0_i32_0 : i32, i32
  }
  func.func @transform_3(%arg0: i32) -> (i32, i32) {
    %c0_i32 = arith.constant 0 : i32
    %c0_i32_0 = arith.constant 0 : i32
    %c0_i32_1 = arith.constant 0 : i32
    return %c0_i32, %c0_i32_0 : i32, i32
  }
  func.func @transform_4(%arg0: i32) -> (i32, i32, i32) {
    %c0_i32 = arith.constant 0 : i32
    %c0_i32_0 = arith.constant 0 : i32
    %c0_i32_1 = arith.constant 0 : i32
    return %arg0, %c0_i32, %c0_i32_0 : i32, i32, i32
  }
  func.func @transform_5(%arg0: i32) -> (i32, i32, i32) {
    %c0_i32 = arith.constant 0 : i32
    %c0_i32_0 = arith.constant 0 : i32
    %c0_i32_1 = arith.constant 0 : i32
    return %arg0, %c0_i32, %c0_i32_0 : i32, i32, i32
  }
  func.func @transform_6(%arg0: i32) -> (i32, i32, i32) {
    %c0_i32 = arith.constant 0 : i32
    %c0_i32_0 = arith.constant 0 : i32
    %c0_i32_1 = arith.constant 0 : i32
    return %arg0, %c0_i32, %c0_i32_0 : i32, i32, i32
  }
  func.func @transform_7(%arg0: i32) -> (i32, i32, i32) {
    %c0_i32 = arith.constant 0 : i32
    %c0_i32_0 = arith.constant 0 : i32
    %c0_i32_1 = arith.constant 0 : i32
    return %arg0, %c0_i32, %c0_i32_0 : i32, i32, i32
  }
  func.func @transform_8(%arg0: i32) -> (i32, i32, i32) {
    %c0_i32 = arith.constant 0 : i32
    %c0_i32_0 = arith.constant 0 : i32
    %c0_i32_1 = arith.constant 0 : i32
    return %arg0, %c0_i32, %c0_i32_0 : i32, i32, i32
  }
  func.func @transform_9(%arg0: i32) -> (i32, i32) {
    %c0_i32 = arith.constant 0 : i32
    %c0_i32_0 = arith.constant 0 : i32
    %c0_i32_1 = arith.constant 0 : i32
    return %c0_i32, %c0_i32_0 : i32, i32
  }
  func.func @transform_10(%arg0: i32) -> (i32, i32) {
    %c0_i32 = arith.constant 0 : i32
    %c0_i32_0 = arith.constant 0 : i32
    %c0_i32_1 = arith.constant 0 : i32
    return %c0_i32, %c0_i32_0 : i32, i32
  }
  func.func @transform_11(%arg0: i32) -> (i32, i32) {
    %c0_i32 = arith.constant 0 : i32
    %c0_i32_0 = arith.constant 0 : i32
    %c0_i32_1 = arith.constant 0 : i32
    return %c0_i32, %c0_i32_0 : i32, i32
  }
}

</mosaic_0001>

<bundles_post_ra>
// kernel: reencoder_forward.1
= control target key start
LH: loop header
LB: loop body
LE: loop exit
PB: predicated region body
PF: predicated region fallthrough
CT: control target
= control target key end

     0   :  { %s2340_s17 = smov 0   ;;  %s2692_s0 = inlined_call_operand.vmem [shape: f32[16,32], index: 0, kind: input, shape index: {}]   ;;  %s2693_s1 = inlined_call_operand.vmem [shape: f32[64,64], index: 1, kind: input, shape index: {}]   ;;  %s2694_s2 = inlined_call_operand.vmem [shape: f32[32,64], index: 2, kind: input, shape index: {}]   ;;  %s2695_s3 = inlined_call_operand.vmem [shape: f32[1,64], index: 3, kind: input, shape index: {}]   ;;  %s2696_s4 = inlined_call_operand.vmem [shape: f32[2,64,192], index: 4, kind: input, shape index: {}]   ;;  %s2697_s5 = inlined_call_operand.vmem [shape: f32[2,64,64], index: 5, kind: input, shape index: {}]   ;;  %s2698_s6 = inlined_call_operand.vmem [shape: f32[2,64,128], index: 6, kind: input, shape index: {}]   ;;  %s2699_s7 = inlined_call_operand.vmem [shape: f32[2,128,64], index: 7, kind: input, shape index: {}]   ;;  %s2700_s8 = inlined_call_operand.vmem [shape: f32[2,8,192], index: 8, kind: input, shape index: {}]   ;;  %s2701_s9 = inlined_call_operand.vmem [shape: f32[64,32], index: 9, kind: input, shape index: {}]   ;;  %s2702_s10 = inlined_call_operand.vmem [shape: f32[1,32], index: 10, kind: input, shape index: {}]   ;;  %s2703_s11 = inlined_call_operand.vmem [shape: f32[16,32], index: 11, kind: output, shape index: {}]  }
   0x1 LB: > { %s2346_s18 = sadd.s32 4294967295, %s2271_s17   ;;  %p1725_p0 = scmp.ge.s32.totalorder %s2271_s17, 1  ;;  %s2271_s17 = sphi %s2340_s17, %s21_s17  }
   0x2   : > { %p372_p1 = scmp.lt.s32.totalorder %s2271_s17, 3 }
   0x4   : > { %p373_p2 = pnand %p1725_p0, %p372_p1 }
   0x5   : > { %p427_p3 = scmp.lt.s32.totalorder (!%p373_p2), %s2346_s18, 1  ;;  %p1736_p4 = scmp.ne.s32.totalorder (!%p373_p2), %s2346_s18, 0 }
   0x6   : > { %376 = sbr.rel (%p373_p2) target bundleno = 3160 (0xc58), region = 64 }
   0xd   : > { %s428_s19 = scalar_select %p427_p3, %s2346_s18, 1 }
   0xe   : > { %455 = sbr.rel (%p1736_p4) target bundleno = 241 (0xf1), region = 68  ;;  %v458_v0 = vld [vmem:[%s2694_s2] sm:$0xff] (!%p1736_p4)  ;;  %v459_v1 = vld [vmem:[%s2694_s2 + $0x8] sm:$0xff] (!%p1736_p4)  ;;  %v460_v2 = vld [vmem:[%s2694_s2 + $0x10] sm:$0xff] (!%p1736_p4)  ;;  %vm469_vm0 = vcmask (!%p1736_p4), 261120   ;;  %vm551_vm1 = vcmask (!%p1736_p4), 523264  }
   0xf   : > { %s1776_s20 = sshll.u32 %s428_s19, 7  ;;  %s1777_s21 = sshll.u32 %s428_s19, 6  ;;  %v2026_v3 = vpack.c.bf16 (!%p1736_p4), %v459_v1, %v458_v0  ;;  %v461_v4 = vld [vmem:[%s2694_s2 + $0x18] sm:$0xff] (!%p1736_p4)  ;;  %v456_v5 = vld [vmem:[%s2692_s0] sm:$0xff] (!%p1736_p4)  ;;  %v457_v7 = vld [vmem:[%s2692_s0 + $0x8] sm:$0xff] (!%p1736_p4) }
  0x10   : > { %s2355_s24 = scalar_lea.vmem %s2696_s4, %s1776_s20  ;;  %s2360_s27 = scalar_lea.vmem %s2697_s5, %s1777_s21  ;;  %v2030_v6 = vpack.c.bf16 (!%p1736_p4), %v461_v4, %v460_v2  ;;  %1875 = vmatprep.mubr.msk.f32.mxu0 (!%p1736_p4), %vm469_vm0, %v456_v5  ;;  %v1737_v8 = vld [vmem:[%s2695_s3] ss:$0 sm:$0xff] (!%p1736_p4) }
  0x11   : > { %s2365_s30 = scalar_lea.vmem %s2698_s6, %s1777_s21  ;;  %s2370_s14 = scalar_lea.vmem %s2699_s7, %s1776_s20  ;;  %2027 = vmatprep.subr.bf16.mxu0 (!%p1736_p4), %v2026_v3 }
  0x12   : > { %s1780_s15 = sshll.u32 %s428_s19, 4  ;;  %2029 = vmatpush3.bf16.msra.mxu0 (!%p1736_p4), %v2026_v3 }
  0x13   : > { %s2375_s23 = scalar_lea.vmem %s2700_s8, %s1780_s15  ;;  %2031 = vmatprep.subr.bf16.mxu0 (!%p1736_p4), %v2030_v6 }
  0x16   : > { %2033 = vmatpush3.bf16.msra.mxu0 %v2030_v6 }
  0x19   : > { %1876 = vmatmul.mubr.msk.f32.vlgmr.msra.gmra.mrb[0].mxu0 %vm469_vm0, %v457_v7 }
  0xec   : > { %v1877_v9 = vpop.f32.mrb[0].mxu0 }
  0xed   : > { %v548_v10 = vadd.f32 %v1877_v9, %v1737_v8  ;;  %v542_v11 = vpop.f32.mrb[1].mxu0 }
  0xee   : > { %v543_v12 = vadd.f32 %v1737_v8, %v542_v11 }
  0xef   : > { %553 = vst.msk [vmem:[#allocation2 + $0x8] sm:$0xff] %vm551_vm1, %v548_v10 }
  0xf0   : > { %552 = vst.msk [vmem:[#allocation2] sm:$0xff] %vm551_vm1, %v543_v12 }
  0xf1 PF: > { %v559_v13 = vld [vmem:[%s2355_s24 + $0x8] sm:$0xff]  ;;  %v561_v14 = vld [vmem:[%s2355_s24 + $0x18] sm:$0xff]  ;;  %v558_v15 = vld [vmem:[%s2355_s24] sm:$0xff]  ;;  %v2273_v20 = vmov 0.0   ;;  %vm582_vm2 = vcmask 523264   ;;  %v574_v40 = vlaneseq  ;;  %vm671_vm3 = vcmask 392192  }
  0xf2   : > { %v2034_v16 = vpack.c.bf16 %v561_v14, %v559_v13  ;;  %v560_v17 = vld [vmem:[%s2355_s24 + $0x10] sm:$0xff]  ;;  %v563_v18 = vld [vmem:[%s2355_s24 + $0x28] sm:$0xff]  ;;  %v565_v19 = vld [vmem:[%s2355_s24 + $0x38] sm:$0xff]  ;;  %653 = vmatprep.mubr.f32.mxu1 %v2273_v20  ;;  %vm762_vm4 = vcmask 130048   ;;  %s2276_s21 = smov 112   ;;  %vm687_vm5 = vcmask 261120  }
  0xf3   : > { %v2036_v21 = vpack.c.bf16 %v560_v17, %v558_v15  ;;  %v2038_v22 = vpack.c.bf16 %v565_v19, %v563_v18  ;;  %v562_v23 = vld [vmem:[%s2355_s24 + $0x20] sm:$0xff]  ;;  %v564_v24 = vld [vmem:[%s2355_s24 + $0x30] sm:$0xff]  ;;  %v567_v25 = vld [vmem:[%s2355_s24 + $0x48] sm:$0xff]  ;;  %v2423_v41 = vshrl.u32 %v574_v40, 7  ;;  %s2277_s19 = smov 96   ;;  %s2278_s12 = smov 16  }
  0xf4   : > { %2035 = vmatprep.subr.bf16.mxu1 %v2034_v16  ;;  %v569_v26 = vld [vmem:[%s2355_s24 + $0x58] sm:$0xff]  ;;  %v2040_v27 = vpack.c.bf16 %v564_v24, %v562_v23  ;;  %v566_v29 = vld [vmem:[%s2355_s24 + $0x40] sm:$0xff]  ;;  %v568_v30 = vld [vmem:[%s2355_s24 + $0x50] sm:$0xff]  ;;  %s2279_s13 = smov 48   ;;  %vm1146_vm7 = vcmask 261248   ;;  %vm1152_vm8 = vcmask 392448  }
  0xf5   : > { %2037 = vmatpush1.bf16.msra.mxu1 %v2036_v21  ;;  %v2042_v28 = vpack.c.bf16 %v569_v26, %v567_v25  ;;  %v571_v31 = vld [vmem:[%s2355_s24 + $0x68] sm:$0xff]  ;;  %v573_v32 = vld [vmem:[%s2355_s24 + $0x78] sm:$0xff]  ;;  %v2044_v33 = vpack.c.bf16 %v568_v30, %v566_v29  ;;  %v570_v35 = vld [vmem:[%s2355_s24 + $0x60] sm:$0xff]  ;;  %v576_v42 = vsub.s32 0, %v2423_v41  ;;  %vm1158_vm9 = vcmask 523648   ;;  %p1770_p5 = scmp.ne.s32.totalorder %s2346_s18, 1 }
  0xf6   : > { %2039 = vmatprep.subr.bf16.mxu1 %v2038_v22  ;;  %v2046_v34 = vpack.c.bf16 %v573_v32, %v571_v31  ;;  %v572_v36 = vld [vmem:[%s2355_s24 + $0x70] sm:$0xff]  ;;  %v2419_v39 = vld [vmem:[#allocation2 + $0x8] sm:$0xff]  ;;  %v2427_v43 = vld [vmem:[%s2375_s23] sm:$0xff]  ;;  %s2274_s24 = smov 80  }
  0xf7   : > { %v2048_v37 = vpack.c.bf16 %v572_v36, %v570_v35  ;;  %v2415_v38 = vld [vmem:[#allocation2] sm:$0xff]  ;;  %v557_v44 = vld [vmem:[%s2375_s23 + $0x8] sm:$0xff]  ;;  %v577_v45 = vrot.slane %v2427_v43, %v576_v42  ;;  %s2275_s23 = smov 32   ;;  %vm2468_vm6 = vmpackc.low %vm762_vm4, %vm762_vm4 }
  0xf8   : > { %v581_v46 = vrot.slane %v557_v44, %v576_v42  ;;  %v731_v32 = vld [vmem:[%s2693_s1 + $0x8] sm:$0xff]  ;;  %v732_v42 = vld [vmem:[%s2693_s1 + $0x10] sm:$0xff] }
  0xf9   : > { %2041 = vmatpush1.bf16.msra.mxu1 %v2040_v27 }
  0xfa   : > { %2043 = vmatprep.subr.bf16.mxu1 %v2042_v28 }
  0xfd   : > { %2045 = vmatpush1.bf16.msra.mxu1 %v2044_v33  ;;  %v730_v33 = vld [vmem:[%s2693_s1] sm:$0xff] }
  0xfe   : > { %2047 = vmatprep.subr.bf16.mxu1 %v2046_v34 }
 0x101   : > { %2049 = vmatpush1.bf16.msra.mxu1 %v2048_v37 }
 0x104   : > { %1740 = vmatmul.mubr.msk.f32.vlgmr.msra.gmra.mrb[0].mxu1 %vm582_vm2, %v2415_v38 }
 0x105   : > { %659 = vmatprep.mubr.f32.mxu1 %v2273_v20 }
 0x108   : > { %1741 = vmatmul.mubr.msk.f32.gmra.mrb[2].mxu1 %vm582_vm2, %v2419_v39 }
 0x1d7   : > { %v655_v47 = vpop.f32.mrb[0].mxu1 }
 0x1d8   : > { %v656_v48 = vadd.f32 %v655_v47, %v577_v45  ;;  %v657_v49 = vpop.f32.mrb[1].mxu1 }
 0x1d9   : > { %v658_v50 = vadd.f32 %v657_v49, %v581_v46  ;;  %v734_v49 = vld [vmem:[%s2693_s1 + $0x20] sm:$0xff] }
 0x1da   : > { %672 = vst.msk [vmem:[#allocation4] sm:$0xff] %vm671_vm3, %v656_v48  ;;  %675 = vrot.lane.b32.xlu0 %v656_v48, %s2274_s24 }
 0x1db   : > { %667 = vst.msk [vmem:[#allocation3 + $0x8] sm:$0xff] %vm582_vm2, %v658_v50  ;;  %v661_v51 = vpop.f32.mrb[2].mxu1 }
 0x1dc   : > { %v662_v52 = vadd.f32 %v661_v51, %v577_v45  ;;  %v663_v53 = vpop.f32.mrb[3].mxu1 }
 0x1dd   : > { %v664_v54 = vadd.f32 %v663_v53, %v581_v46  ;;  %v733_v46 = vld [vmem:[%s2693_s1 + $0x18] sm:$0xff]  ;;  %v735_v53 = vld [vmem:[%s2693_s1 + $0x28] sm:$0xff] }
 0x1de   : > { %698 = vst.msk [vmem:[#allocation4 + $0x20] sm:$0xff] %vm671_vm3, %v662_v52  ;;  %683 = vrot.lane.b32.xlu0 %v656_v48, %s2275_s23 }
 0x1df   : > { %669 = vst.msk [vmem:[#allocation3 + $0x18] sm:$0xff] %vm582_vm2, %v664_v54 }
 0x1e1   : > { %v722_v55 = vld [vmem:[#allocation4] sm:$0xff] }
 0x1e2   : > { %v680_v56 = vld [vmem:[#allocation3 + $0x8] sm:$0xff]  ;;  %701 = vrot.lane.b32.xlu0 %v662_v52, %s2274_s24  ;;  %1894 = vmatprep.mubr.msk.f32.mxu1 %vm762_vm4, %v722_v55 }
 0x1e3   : > { %685 = vrot.lane.b32.xlu1 %v680_v56, %s2275_s23 }
 0x1e5   : > { %v726_v3 = vld [vmem:[#allocation4 + $0x20] sm:$0xff] }
 0x1e6   : > { %v706_v57 = vld [vmem:[#allocation3 + $0x18] sm:$0xff] }
 0x1e7   : > { %693 = vrot.lane.b32.xlu1 %v680_v56, %s2276_s21  ;;  %711 = vrot.lane.b32.xlu0 %v706_v57, %s2275_s23  ;;  %v736_v56 = vld [vmem:[%s2693_s1 + $0x30] sm:$0xff] }
 0x1eb   : > { %709 = vrot.lane.b32.xlu1 %v662_v52, %s2275_s23 }
 0x1ef   : > { %718 = vrot.lane.b32.xlu1 %v706_v57, %s2276_s21 }
 0x24c   : > { %v676_v58 = vpop.permute.xlu0 %675 }
 0x24d   : > { %678 = vst.msk [vmem:[#allocation4 + $0x8] sm:$0xff] %vm671_vm3, %v676_v58 }
 0x250   : > { %v684_v59 = vpop.permute.xlu0 %683 }
 0x254   : > { %v702_v60 = vpop.permute.xlu0 %701  ;;  %v723_v61 = vld [vmem:[#allocation4 + $0x8] sm:$0xff] }
 0x255   : > { %v686_v62 = vpop.permute.xlu1 %685  ;;  %704 = vst.msk [vmem:[#allocation4 + $0x28] sm:$0xff] %vm671_vm3, %v702_v60  ;;  %v2444_v63 = vpack.i.bf16 %v723_v61, %v722_v55 }
 0x256   : > { %v688_v0 = vsel %vm687_vm5, %v684_v59, %v686_v62 }
 0x257   : > { %690 = vst.msk [vmem:[#allocation4 + $0x10] sm:$0xff] %vm671_vm3, %v688_v0  ;;  %2186 = vrot.lane.b32.xlu0 %v2444_v63, %s2276_s21 }
 0x259   : > { %v694_v1 = vpop.permute.xlu1 %693  ;;  %v712_v2 = vpop.permute.xlu0 %711 }
 0x25a   : > { %696 = vst.msk [vmem:[#allocation4 + $0x18] sm:$0xff] %vm671_vm3, %v694_v1 }
 0x25c   : > { %v727_v4 = vld [vmem:[#allocation4 + $0x28] sm:$0xff] }
 0x25d   : > { %v710_v5 = vpop.permute.xlu1 %709  ;;  %v2451_v6 = vpack.i.bf16 %v727_v4, %v726_v3 }
 0x25e   : > { %v713_v7 = vsel %vm687_vm5, %v710_v5, %v712_v2  ;;  %v724_v9 = vld [vmem:[#allocation4 + $0x10] sm:$0xff] }
 0x25f   : > { %715 = vst.msk [vmem:[#allocation4 + $0x30] sm:$0xff] %vm671_vm3, %v713_v7  ;;  %2196 = vrot.lane.b32.xlu0 %v2451_v6, %s2276_s21 }
 0x261   : > { %v719_v8 = vpop.permute.xlu1 %718  ;;  %v725_v10 = vld [vmem:[#allocation4 + $0x18] sm:$0xff] }
 0x262   : > { %721 = vst.msk [vmem:[#allocation4 + $0x38] sm:$0xff] %vm671_vm3, %v719_v8  ;;  %v2458_v11 = vpack.i.bf16 %v725_v10, %v724_v9 }
 0x264   : > { %2191 = vrot.lane.b32.xlu1 %v2458_v11, %s2276_s21 }
 0x266   : > { %v728_v12 = vld [vmem:[#allocation4 + $0x30] sm:$0xff] }
 0x269   : > { %v729_v13 = vld [vmem:[#allocation4 + $0x38] sm:$0xff] }
 0x26a   : > { %v2462_v14 = vpack.i.bf16 %v729_v13, %v728_v12 }
 0x26c   : > { %2201 = vrot.lane.b32.xlu1 %v2462_v14, %s2276_s21 }
 0x2c9   : > { %v2187_v15 = vpop.permute.xlu0 %2186 }
 0x2ca   : > { %v2189_v16 = vunpack.i.h.bf16 %v2187_v15  ;;  %v2188_v17 = vunpack.i.l.bf16 %v2187_v15 }
 0x2cc   : > { %v2050_v19 = vpack.c.bf16 %v2189_v16, %v2188_v17 }
 0x2ce   : > { %2052 = vmatprep.subr.msk.bf16.mxu1 %vm2468_vm6, %v2050_v19 }
 0x2cf   : > { %2055 = vmatpush3.bf16.xpose.msk.msra.mxu1 %vm2468_vm6, %v2050_v19 }
 0x2d1   : > { %v2197_v20 = vpop.permute.xlu0 %2196 }
 0x2d2   : > { %v2199_v24 = vunpack.i.h.bf16 %v2197_v20  ;;  %v2198_v25 = vunpack.i.l.bf16 %v2197_v20 }
 0x2d4   : > { %v2062_v27 = vpack.c.bf16 %v2199_v24, %v2198_v25 }
 0x2d6   : > { %v2192_v21 = vpop.permute.xlu1 %2191 }
 0x2d7   : > { %v2194_v22 = vunpack.i.h.bf16 %v2192_v21  ;;  %v2193_v23 = vunpack.i.l.bf16 %v2192_v21 }
 0x2d9   : > { %v2056_v26 = vpack.c.bf16 %v2194_v22, %v2193_v23 }
 0x2db   : > { %2058 = vmatprep.subr.msk.bf16.mxu1 %vm2468_vm6, %v2056_v26 }
 0x2dc   : > { %2061 = vmatpush3.bf16.xpose.msk.msra.mxu1 %vm2468_vm6, %v2056_v26 }
 0x2dd   : > { %2064 = vmatprep.subr.msk.bf16.mxu1 %vm2468_vm6, %v2062_v27 }
 0x2de   : > { %v2202_v28 = vpop.permute.xlu1 %2201 }
 0x2df   : > { %v2204_v29 = vunpack.i.h.bf16 %v2202_v28  ;;  %v2203_v30 = vunpack.i.l.bf16 %v2202_v28 }
 0x2e1   : > { %v2068_v31 = vpack.c.bf16 %v2204_v29, %v2203_v30 }
 0x2e4   : > { %2067 = vmatpush3.bf16.xpose.msk.msra.mxu1 %vm2468_vm6, %v2062_v27 }
 0x2e5   : > { %2070 = vmatprep.subr.msk.bf16.mxu1 %vm2468_vm6, %v2068_v31 }
 0x2ec   : > { %2073 = vmatpush3.bf16.xpose.msk.msra.mxu1 %vm2468_vm6, %v2068_v31 }
 0x2f3   : > { %1895 = vmatmul.mubr.msk.f32.vlgmr.msra.gmra.mrb[4].mxu1 %vm762_vm4, %v723_v61  ;;  %v737_v61 = vld [vmem:[%s2693_s1 + $0x38] sm:$0xff] }
 0x2f4   : > { %1897 = vmatprep.mubr.msk.f32.mxu1 %vm762_vm4, %v724_v9 }
 0x2f7   : > { %1898 = vmatmul.mubr.msk.f32.gmra.mrb[6].mxu1 %vm762_vm4, %v725_v10 }
 0x2f8   : > { %1900 = vmatprep.mubr.msk.f32.mxu1 %vm762_vm4, %v726_v3 }
 0x2fb   : > { %1901 = vmatmul.mubr.msk.f32.gmra.mrb[8].mxu1 %vm762_vm4, %v727_v4 }
 0x2fc   : > { %1903 = vmatprep.mubr.msk.f32.mxu1 %vm762_vm4, %v728_v12 }
 0x2ff   : > { %1904 = vmatmul.mubr.msk.f32.gmra.mrb[10].mxu1 %vm762_vm4, %v729_v13 }
 0x3c6   : > { %v1896_v34 = vpop.f32.mrb[4].mxu1 }
 0x3c7   : > { %v867_v35 = vadd.f32 %v1896_v34, %v731_v32  ;;  %v861_v36 = vpop.f32.mrb[5].mxu1 }
 0x3c8   : > { %v862_v37 = vadd.f32 %v861_v36, %v730_v33 }
 0x3c9   : > { %v903_v40 = vsel %vm582_vm2, %v867_v35, -inf }
 0x3ca   : > { %904 = vmax.xlane.f32.xlu1 %v903_v40  ;;  %v1899_v44 = vpop.f32.mrb[6].mxu1  ;;  %v900_v45 = vsel %vm582_vm2, %v862_v37, -inf }
 0x3cb   : > { %v871_v47 = vpop.f32.mrb[7].mxu1  ;;  %901 = vmax.xlane.f32.xlu0 %v900_v45  ;;  %v877_v50 = vadd.f32 %v1899_v44, %v733_v46 }
 0x3cc   : > { %v872_v48 = vadd.f32 %v871_v47, %v732_v42 }
 0x3cd   : > { %v909_v60 = vsel %vm582_vm2, %v877_v50, -inf }
 0x3ce   : > { %v1902_v51 = vpop.f32.mrb[8].mxu1  ;;  %v906_v52 = vsel %vm582_vm2, %v872_v48, -inf }
 0x3cf   : > { %v881_v54 = vpop.f32.mrb[9].mxu1  ;;  %907 = vmax.xlane.f32.xlu0 %v906_v52  ;;  %v887_v57 = vadd.f32 %v1902_v51, %v735_v53 }
 0x3d0   : > { %v882_v55 = vadd.f32 %v881_v54, %v734_v49 }
 0x3d1   : > { %v915_v3 = vsel %vm582_vm2, %v887_v57, -inf }
 0x3d2   : > { %v1905_v58 = vpop.f32.mrb[10].mxu1  ;;  %v912_v59 = vsel %vm582_vm2, %v882_v55, -inf }
 0x3d3   : > { %v891_v62 = vpop.f32.mrb[11].mxu1  ;;  %913 = vmax.xlane.f32.xlu1 %v912_v59  ;;  %910 = vmax.xlane.f32.xlu0 %v909_v60  ;;  %v897_v1 = vadd.f32 %v1905_v58, %v737_v61 }
 0x3d4   : > { %v892_v0 = vadd.f32 %v891_v62, %v736_v56 }
 0x3d5   : > { %v921_v4 = vsel %vm582_vm2, %v897_v1, -inf }
 0x3d6   : > { %v918_v2 = vsel %vm582_vm2, %v892_v0, -inf }
 0x3d7   : > { %919 = vmax.xlane.f32.xlu1 %v918_v2  ;;  %916 = vmax.xlane.f32.xlu0 %v915_v3 }
 0x3db   : > { %922 = vmax.xlane.f32.xlu0 %v921_v4 }
 0x3e8   : > { %2206 = vrot.lane.b32.xlu1 %v2444_v63, %s2277_s19 }
 0x457   : > { %v905_v5 = vpop.xlane.xlu1 %904 }
 0x458   : > { %v925_v7 = vsub.f32 %v867_v35, %v905_v5  ;;  %v902_v8 = vpop.xlane.xlu0 %901 }
 0x459   : > { %v924_v9 = vsub.f32 %v862_v37, %v902_v8 }
 0x45a   : > { %v934_v10 = vmul.f32 1.442695, %v925_v7 }
 0x45b   : > { %v932_v12 = vmul.f32 1.442695, %v924_v9 }
 0x45c   : > { %2225 = vpow2.f32 %v934_v10  ;;  %v908_v13 = vpop.xlane.xlu0 %907 }
 0x45d   : > { %2227 = vpow2.f32 %v932_v12  ;;  %v926_v15 = vsub.f32 %v872_v48, %v908_v13 }
 0x45f   : > { %v936_v16 = vmul.f32 1.442695, %v926_v15 }
 0x460   : > { %v914_v17 = vpop.xlane.xlu1 %913  ;;  %v911_v18 = vpop.xlane.xlu0 %910 }
 0x461   : > { %2229 = vpow2.f32 %v936_v16  ;;  %v928_v19 = vsub.f32 %v882_v55, %v914_v17  ;;  %v927_v20 = vsub.f32 %v877_v50, %v911_v18 }
 0x463   : > { %v940_v21 = vmul.f32 1.442695, %v928_v19  ;;  %v938_v22 = vmul.f32 1.442695, %v927_v20 }
 0x464   : > { %v920_v23 = vpop.xlane.xlu1 %919  ;;  %v917_v63 = vpop.xlane.xlu0 %916 }
 0x465   : > { %2231 = vpow2.f32 %v940_v21  ;;  %v929_v24 = vsub.f32 %v887_v57, %v917_v63  ;;  %v930_v29 = vsub.f32 %v892_v0, %v920_v23 }
 0x466   : > { %v2529_v25 = vpop.eup %2225  ;;  %2233 = vpow2.f32 %v938_v22 }
 0x467   : > { %v2228_v26 = vpop.eup %2227  ;;  %v942_v27 = vmul.f32 1.442695, %v929_v24  ;;  %v951_v28 = vsel %vm582_vm2, %v2529_v25, 0.0  ;;  %v944_v42 = vmul.f32 1.442695, %v930_v29 }
 0x468   : > { %v2207_v30 = vpop.permute.xlu1 %2206  ;;  %952 = vadd.xlane.f32.xlu0 %v951_v28  ;;  %v923_v31 = vpop.xlane.xlu0 %922  ;;  %v948_v32 = vsel %vm582_vm2, %v2228_v26, 0.0  ;;  %v1179_v28 = vld [vmem:[%s2360_s27 + $0x8] sm:$0xff] }
 0x469   : > { %v2209_v33 = vunpack.i.h.bf16 %v2207_v30  ;;  %v2208_v34 = vunpack.i.l.bf16 %v2207_v30  ;;  %v931_v35 = vsub.f32 %v897_v1, %v923_v31  ;;  %949 = vadd.xlane.f32.xlu1 %v948_v32  ;;  %2235 = vpow2.f32 %v942_v27  ;;  %v1178_v27 = vld [vmem:[%s2360_s27] sm:$0xff]  ;;  %v1180_v30 = vld [vmem:[%s2360_s27 + $0x10] sm:$0xff]  ;;  %v1181_v31 = vld [vmem:[%s2360_s27 + $0x18] sm:$0xff] }
 0x46a   : > { %v2090_v29 = vpack.c.bf16 %v1179_v28, %v1178_v27  ;;  %v2094_v32 = vpack.c.bf16 %v1181_v31, %v1180_v30  ;;  %v1409_v27 = vld [vmem:[%s2370_s14 + $0x10] sm:$0xff]  ;;  %v1411_v31 = vld [vmem:[%s2370_s14 + $0x20] sm:$0xff] }
 0x46b   : > { %v2534_v36 = vpop.eup %2229  ;;  %v946_v37 = vmul.f32 1.442695, %v931_v35  ;;  %v2074_v40 = vpack.c.bf16 %v2209_v33, %v2208_v34  ;;  %v1182_v33 = vld [vmem:[%s2360_s27 + $0x20] sm:$0xff]  ;;  %v1183_v34 = vld [vmem:[%s2360_s27 + $0x28] sm:$0xff] }
 0x46c   : > { %v954_v44 = vsel %vm582_vm2, %v2534_v36, 0.0 }
 0x46d   : > { %2237 = vpow2.f32 %v946_v37  ;;  %2075 = vmatprep.subr.bf16.mxu0 %v2074_v40  ;;  %955 = vadd.xlane.f32.xlu1 %v954_v44 }
 0x46e   : > { %2077 = vmatpush3.bf16.msra.mxu0 %v2074_v40  ;;  %2239 = vpow2.f32 %v944_v42  ;;  %v1184_v40 = vld [vmem:[%s2360_s27 + $0x30] sm:$0xff]  ;;  %v1185_v42 = vld [vmem:[%s2360_s27 + $0x38] sm:$0xff] }
 0x46f   : > { %v2538_v45 = vpop.eup %2231  ;;  %v2102_v44 = vpack.c.bf16 %v1185_v42, %v1184_v40  ;;  %v1416_v40 = vld [vmem:[%s2370_s14 + $0x48] sm:$0xff] }
 0x470   : > { %v2540_v46 = vpop.eup %2233  ;;  %v960_v47 = vsel %vm582_vm2, %v2538_v45, 0.0 }
 0x471   : > { %961 = vadd.xlane.f32.xlu1 %v960_v47  ;;  %v957_v48 = vsel %vm582_vm2, %v2540_v46, 0.0 }
 0x472   : > { %958 = vadd.xlane.f32.xlu0 %v957_v48 }
 0x473   : > { %v2546_v49 = vpop.eup %2235 }
 0x474   : > { %v963_v50 = vsel %vm582_vm2, %v2546_v49, 0.0 }
 0x476   : > { %964 = vadd.xlane.f32.xlu0 %v963_v50 }
 0x477   : > { %v2550_v51 = vpop.eup %2237 }
 0x478   : > { %v969_v52 = vsel %vm582_vm2, %v2550_v51, 0.0  ;;  %v2240_v53 = vpop.eup %2239 }
 0x479   : > { %v966_v54 = vsel %vm582_vm2, %v2240_v53, 0.0 }
 0x47a   : > { %970 = vadd.xlane.f32.xlu0 %v969_v52 }
 0x47e   : > { %967 = vadd.xlane.f32.xlu0 %v966_v54 }
 0x482   : > { %2216 = vrot.lane.b32.xlu1 %v2451_v6, %s2277_s19 }
 0x486   : > { %2221 = vrot.lane.b32.xlu1 %v2462_v14, %s2277_s19 }
 0x494   : > { %2211 = vrot.lane.b32.xlu0 %v2458_v11, %s2277_s19 }
 0x4f5   : > { %v953_v56 = vpop.xlane.xlu0 %952 }
 0x4f6   : > { %v950_v55 = vpop.xlane.xlu1 %949 }
 0x4f7   : > { %2241 = vrcp.f32 %v950_v55 }
 0x4f8   : > { %2243 = vrcp.f32 %v953_v56 }
 0x4fa   : > { %v956_v57 = vpop.xlane.xlu1 %955 }
 0x4fb   : > { %2245 = vrcp.f32 %v956_v57 }
 0x4fe   : > { %v962_v62 = vpop.xlane.xlu1 %961 }
 0x4ff   : > { %v959_v58 = vpop.xlane.xlu0 %958 }
 0x500   : > { %2247 = vrcp.f32 %v959_v58 }
 0x501   : > { %v2242_v59 = vpop.eup %2241  ;;  %2249 = vrcp.f32 %v962_v62 }
 0x502   : > { %v980_v60 = vmul.f32 %v2242_v59, %v2228_v26  ;;  %v2217_v1 = vpop.permute.xlu1 %2216  ;;  %v2244_v13 = vpop.eup %2243  ;;  %v1188_v59 = vsub.s32 1, %v2423_v41 }
 0x503   : > { %v965_v61 = vpop.xlane.xlu0 %964  ;;  %v2219_v3 = vunpack.i.h.bf16 %v2217_v1  ;;  %v2218_v14 = vunpack.i.l.bf16 %v2217_v1  ;;  %v981_v16 = vmul.f32 %v2244_v13, %v2529_v25  ;;  %v1312_v13 = vld [vmem:[%s2365_s30] sm:$0xff] }
 0x504   : > { %1922 = vmatprep.mubr.msk.f32.mxu0 %vm582_vm2, %v980_v60  ;;  %2251 = vrcp.f32 %v965_v61  ;;  %v1189_v60 = vrot.slane %v2427_v43, %v1188_v59 }
 0x505   : > { %v2082_v8 = vpack.c.bf16 %v2219_v3, %v2218_v14  ;;  %v2246_v15 = vpop.eup %2245 }
 0x506   : > { %v2222_v11 = vpop.permute.xlu1 %2221  ;;  %v982_v18 = vmul.f32 %v2246_v15, %v2534_v36  ;;  %v2098_v36 = vpack.c.bf16 %v1183_v34, %v1182_v33  ;;  %v1313_v15 = vld [vmem:[%s2365_s30 + $0x8] sm:$0xff]  ;;  %v1413_v34 = vld [vmem:[%s2370_s14 + $0x30] sm:$0xff] }
 0x507   : > { %v971_v0 = vpop.xlane.xlu0 %970  ;;  %v2224_v9 = vunpack.i.h.bf16 %v2222_v11  ;;  %v2223_v10 = vunpack.i.l.bf16 %v2222_v11 }
 0x509   : > { %v2086_v12 = vpack.c.bf16 %v2224_v9, %v2223_v10 }
 0x50a   : > { %v2248_v17 = vpop.eup %2247 }
 0x50b   : > { %v968_v6 = vpop.xlane.xlu0 %967  ;;  %v2250_v19 = vpop.eup %2249  ;;  %v983_v20 = vmul.f32 %v2248_v17, %v2540_v46  ;;  %v1314_v17 = vld [vmem:[%s2365_s30 + $0x10] sm:$0xff] }
 0x50c   : > { %2253 = vrcp.f32 %v968_v6  ;;  %v984_v22 = vmul.f32 %v2250_v19, %v2538_v45 }
 0x50d   : > { %2255 = vrcp.f32 %v971_v0 }
 0x50e   : > { %v2252_v21 = vpop.eup %2251 }
 0x50f   : > { %v2212_v2 = vpop.permute.xlu0 %2211  ;;  %v985_v63 = vmul.f32 %v2252_v21, %v2546_v49  ;;  %v1317_v21 = vld [vmem:[%s2365_s30 + $0x28] sm:$0xff] }
 0x510   : > { %v2214_v4 = vunpack.i.h.bf16 %v2212_v2  ;;  %v2213_v5 = vunpack.i.l.bf16 %v2212_v2 }
 0x512   : > { %v2078_v7 = vpack.c.bf16 %v2214_v4, %v2213_v5 }
 0x514   : > { %2079 = vmatprep.subr.bf16.mxu0 %v2078_v7 }
 0x515   : > { %2081 = vmatpush3.bf16.msra.mxu0 %v2078_v7 }
 0x516   : > { %2083 = vmatprep.subr.bf16.mxu0 %v2082_v8  ;;  %v2254_v23 = vpop.eup %2253 }
 0x517   : > { %v2256_v24 = vpop.eup %2255  ;;  %v986_v25 = vmul.f32 %v2254_v23, %v2240_v53  ;;  %v1318_v23 = vld [vmem:[%s2365_s30 + $0x30] sm:$0xff] }
 0x518   : > { %v987_v26 = vmul.f32 %v2256_v24, %v2550_v51 }
 0x519   : > { %2085 = vmatpush3.bf16.msra.mxu0 %v2082_v8 }
 0x51a   : > { %2087 = vmatprep.subr.bf16.mxu0 %v2086_v12 }
 0x51d   : > { %2089 = vmatpush3.bf16.msra.mxu0 %v2086_v12 }
 0x51e   : > { %2091 = vmatprep.subr.bf16.mxu0 %v2090_v29 }
 0x520   : > { %1923 = vmatmul.mubr.msk.f32.vlgmr.msra.gmra.mrb[0].mxu0 %vm582_vm2, %v981_v16  ;;  %v2106_v16 = vpack.c.bf16 %v1313_v15, %v1312_v13  ;;  %v1425_v13 = vsub.s32 5, %v2423_v41 }
 0x521   : > { %1925 = vmatprep.mubr.msk.f32.mxu0 %vm582_vm2, %v982_v18  ;;  %2093 = vmatpush3.bf16.msra.mxu0 %v2090_v29  ;;  %v1315_v18 = vld [vmem:[%s2365_s30 + $0x18] sm:$0xff] }
 0x522   : > { %2095 = vmatprep.subr.bf16.mxu0 %v2094_v32  ;;  %2107 = vmatprep.subr.bf16.mxu1 %v2106_v16  ;;  %v2110_v19 = vpack.c.bf16 %v1315_v18, %v1314_v17  ;;  %v1410_v29 = vld [vmem:[%s2370_s14 + $0x18] sm:$0xff]  ;;  %v1426_v15 = vrot.slane %v2427_v43, %v1425_v13 }
 0x523   : > { %2109 = vmatpush3.bf16.msra.mxu1 %v2106_v16  ;;  %v2126_v30 = vpack.c.bf16 %v1410_v29, %v1409_v27 }
 0x524   : > { %1926 = vmatmul.mubr.msk.f32.gmra.mrb[2].mxu0 %vm582_vm2, %v983_v20  ;;  %2111 = vmatprep.subr.bf16.mxu1 %v2110_v19  ;;  %v1316_v20 = vld [vmem:[%s2365_s30 + $0x20] sm:$0xff] }
 0x525   : > { %1928 = vmatprep.mubr.msk.f32.mxu0 %vm582_vm2, %v984_v22  ;;  %2097 = vmatpush3.bf16.msra.mxu0 %v2094_v32  ;;  %v2114_v22 = vpack.c.bf16 %v1317_v21, %v1316_v20  ;;  %v1412_v32 = vld [vmem:[%s2370_s14 + $0x28] sm:$0xff] }
 0x526   : > { %2099 = vmatprep.subr.bf16.mxu0 %v2098_v36  ;;  %v2130_v33 = vpack.c.bf16 %v1412_v32, %v1411_v31 }
 0x527   : > { %2113 = vmatpush3.bf16.msra.mxu1 %v2110_v19 }
 0x528   : > { %1929 = vmatmul.mubr.msk.f32.gmra.mrb[4].mxu0 %vm582_vm2, %v985_v63  ;;  %2115 = vmatprep.subr.bf16.mxu1 %v2114_v22  ;;  %v1319_v63 = vld [vmem:[%s2365_s30 + $0x38] sm:$0xff] }
 0x529   : > { %1931 = vmatprep.mubr.msk.f32.mxu0 %vm582_vm2, %v986_v25  ;;  %2101 = vmatpush3.bf16.msra.mxu0 %v2098_v36  ;;  %v2118_v24 = vpack.c.bf16 %v1319_v63, %v1318_v23  ;;  %v1407_v25 = vld [vmem:[%s2370_s14] sm:$0xff] }
 0x52a   : > { %2103 = vmatprep.subr.bf16.mxu0 %v2102_v44 }
 0x52b   : > { %2117 = vmatpush3.bf16.msra.mxu1 %v2114_v22 }
 0x52c   : > { %1932 = vmatmul.mubr.msk.f32.gmra.mrb[6].mxu0 %vm582_vm2, %v987_v26  ;;  %2119 = vmatprep.subr.bf16.mxu1 %v2118_v24  ;;  %v1408_v26 = vld [vmem:[%s2370_s14 + $0x8] sm:$0xff] }
 0x52d   : > { %2105 = vmatpush3.bf16.msra.mxu0 %v2102_v44  ;;  %v2122_v28 = vpack.c.bf16 %v1408_v26, %v1407_v25  ;;  %v1417_v44 = vld [vmem:[%s2370_s14 + $0x50] sm:$0xff] }
 0x52f   : > { %2121 = vmatpush3.bf16.msra.mxu1 %v2118_v24  ;;  %2123 = vmatprep.subr.bf16.mxu0 %v2122_v28 }
 0x5f3   : > { %v1924_v35 = vpop.f32.mrb[0].mxu0 }
 0x5f4   : > { %1143 = vrot.lane.b32.xlu1 %v1924_v35, %s2278_s12  ;;  %v1102_v37 = vpop.f32.mrb[1].mxu0  ;;  %v1414_v35 = vld [vmem:[%s2370_s14 + $0x38] sm:$0xff] }
 0x5f5   : > { %1141 = vst.msk [vmem:[#allocation5] sm:$0xff] %vm762_vm4, %v1102_v37  ;;  %v2134_v36 = vpack.c.bf16 %v1414_v35, %v1413_v34  ;;  %v1415_v37 = vld [vmem:[%s2370_s14 + $0x40] sm:$0xff] }
 0x5f6   : > { %v2138_v42 = vpack.c.bf16 %v1416_v40, %v1415_v37 }
 0x5f7   : > { %v1927_v45 = vpop.f32.mrb[2].mxu0 }
 0x5f8   : > { %1155 = vrot.lane.b32.xlu1 %v1927_v45, %s2279_s13  ;;  %v1112_v46 = vpop.f32.mrb[3].mxu0  ;;  %v1418_v45 = vld [vmem:[%s2370_s14 + $0x58] sm:$0xff] }
 0x5fb   : > { %v1930_v47 = vpop.f32.mrb[4].mxu0 }
 0x5fc   : > { %1149 = vrot.lane.b32.xlu1 %v1112_v46, %s2275_s23  ;;  %1162 = vrot.lane.b32.xlu0 %v1930_v47, %s2278_s12  ;;  %v1122_v48 = vpop.f32.mrb[5].mxu0  ;;  %v2142_v46 = vpack.c.bf16 %v1418_v45, %v1417_v44  ;;  %v1419_v47 = vld [vmem:[%s2370_s14 + $0x60] sm:$0xff]  ;;  %v1538_v44 = vsub.s32 7, %v2423_v41 }
 0x5fd   : > { %1160 = vst.msk [vmem:[#allocation5 + $0x8] sm:$0xff] %vm762_vm4, %v1122_v48  ;;  %v1420_v48 = vld [vmem:[%s2370_s14 + $0x68] sm:$0xff] }
 0x5ff   : > { %v1933_v49 = vpop.f32.mrb[6].mxu0 }
 0x600   : > { %1172 = vrot.lane.b32.xlu1 %v1933_v49, %s2279_s13  ;;  %v1132_v50 = vpop.f32.mrb[7].mxu0  ;;  %v2146_v49 = vpack.c.bf16 %v1420_v48, %v1419_v47  ;;  %v1539_v48 = vrot.slane %v2427_v43, %v1538_v44 }
 0x601   : > { %1167 = vrot.lane.b32.xlu0 %v1132_v50, %s2275_s23 }
 0x666   : > { %v1144_v51 = vpop.permute.xlu1 %1143 }
 0x667   : > { %1147 = vst.msk [vmem:[#allocation5] sm:$0xff] %vm1146_vm7, %v1144_v51 }
 0x66a   : > { %v1156_v52 = vpop.permute.xlu1 %1155 }
 0x66e   : > { %v1150_v53 = vpop.permute.xlu1 %1149  ;;  %v1163_v54 = vpop.permute.xlu0 %1162 }
 0x66f   : > { %1153 = vst.msk [vmem:[#allocation5] sm:$0xff] %vm1152_vm8, %v1150_v53 }
 0x670   : > { %1165 = vst.msk [vmem:[#allocation5 + $0x8] sm:$0xff] %vm1146_vm7, %v1163_v54 }
 0x671   : > { %1159 = vst.msk [vmem:[#allocation5] sm:$0xff] %vm1158_vm9, %v1156_v52 }
 0x672   : > { %v1173_v56 = vpop.permute.xlu1 %1172 }
 0x673   : > { %v1168_v55 = vpop.permute.xlu0 %1167 }
 0x674   : > { %1170 = vst.msk [vmem:[#allocation5 + $0x8] sm:$0xff] %vm1152_vm8, %v1168_v55 }
 0x675   : > { %1175 = vst.msk [vmem:[#allocation5 + $0x8] sm:$0xff] %vm1158_vm9, %v1173_v56  ;;  %v1302_v56 = vsub.s32 2, %v2423_v41 }
 0x678   : > { %v1176_v57 = vld [vmem:[#allocation5] sm:$0xff] }
 0x679   : > { %1950 = vmatprep.mubr.msk.f32.mxu0 %vm582_vm2, %v1176_v57  ;;  %v1308_v57 = vsub.s32 3, %v2423_v41 }
 0x67c   : > { %v1177_v58 = vld [vmem:[#allocation5 + $0x8] sm:$0xff] }
 0x67d   : > { %1951 = vmatmul.mubr.msk.f32.vlgmr.msra.gmra.mrb[8].mxu0 %vm582_vm2, %v1177_v58  ;;  %v1303_v58 = vrot.slane %v2427_v43, %v1302_v56 }
 0x67e   : > { %2125 = vmatpush3.bf16.msra.mxu0 %v2122_v28 }
 0x67f   : > { %2127 = vmatprep.subr.bf16.mxu0 %v2126_v30 }
 0x682   : > { %2129 = vmatpush3.bf16.msra.mxu0 %v2126_v30 }
 0x683   : > { %2131 = vmatprep.subr.bf16.mxu0 %v2130_v33 }
 0x686   : > { %2133 = vmatpush3.bf16.msra.mxu0 %v2130_v33 }
 0x687   : > { %2135 = vmatprep.subr.bf16.mxu0 %v2134_v36 }
 0x68a   : > { %2137 = vmatpush3.bf16.msra.mxu0 %v2134_v36 }
 0x68b   : > { %2139 = vmatprep.subr.bf16.mxu0 %v2138_v42 }
 0x68e   : > { %2141 = vmatpush3.bf16.msra.mxu0 %v2138_v42  ;;  %v1532_v42 = vsub.s32 6, %v2423_v41 }
 0x68f   : > { %2143 = vmatprep.subr.bf16.mxu0 %v2142_v46 }
 0x690   : > { %v1533_v45 = vrot.slane %v2427_v43, %v1532_v42 }
 0x692   : > { %2145 = vmatpush3.bf16.msra.mxu0 %v2142_v46 }
 0x693   : > { %2147 = vmatprep.subr.bf16.mxu0 %v2146_v49 }
 0x696   : > { %2149 = vmatpush3.bf16.msra.mxu0 %v2146_v49 }
 0x750   : > { %v1952_v61 = vpop.f32.mrb[8].mxu0 }
 0x751   : > { %v1268_v62 = vadd.f32 %v1952_v61, %v1189_v60  ;;  %v1262_v0 = vpop.f32.mrb[9].mxu0  ;;  %v1309_v61 = vrot.slane %v2427_v43, %v1308_v57  ;;  %v1551_v57 = vld [vmem:[%s2701_s9 + $0x18] sm:$0xff] (!%p1770_p5) }
 0x752   : > { %v1263_v1 = vadd.f32 %v1262_v0, %v1189_v60 }
 0x753   : > { %v1272_v6 = vadd.f32 %v1268_v62, %v2419_v39 }
 0x754   : > { %v1271_v2 = vadd.f32 %v1263_v1, %v2415_v38 }
 0x755   : > { %v1276_v3 = vsel %vm582_vm2, %v1272_v6, 0.0 }
 0x756   : > { %1277 = vadd.xlane.f32.xlu1 %v1276_v3  ;;  %v1273_v14 = vsel %vm582_vm2, %v1271_v2, 0.0 }
 0x757   : > { %1274 = vadd.xlane.f32.xlu0 %v1273_v14  ;;  %v1421_v14 = vld [vmem:[%s2370_s14 + $0x70] sm:$0xff] }
 0x7e3   : > { %v1278_v4 = vpop.xlane.xlu1 %1277 }
 0x7e4   : > { %v1281_v5 = vmul.f32 0.015625, %v1278_v4  ;;  %v1275_v11 = vpop.xlane.xlu0 %1274  ;;  %v1422_v4 = vld [vmem:[%s2370_s14 + $0x78] sm:$0xff] }
 0x7e5   : > { %v1280_v7 = vmul.f32 0.015625, %v1275_v11  ;;  %v1322_v11 = vsub.s32 4, %v2423_v41  ;;  %v1548_v41 = vld [vmem:[%s2701_s9] sm:$0xff] (!%p1770_p5) }
 0x7e6   : > { %v2595_v8 = vsub.f32 %v1272_v6, %v1281_v5  ;;  %v2150_v5 = vpack.c.bf16 %v1422_v4, %v1421_v14 }
 0x7e7   : > { %v2597_v9 = vsub.f32 %v1271_v2, %v1280_v7  ;;  %v1323_v7 = vrot.slane %v2427_v43, %v1322_v11  ;;  %v1549_v43 = vld [vmem:[%s2701_s9 + $0x8] sm:$0xff] (!%p1770_p5) }
 0x7e8   : > { %v1285_v10 = vmul.f32 %v2595_v8, %v2595_v8  ;;  %2151 = vmatprep.subr.bf16.mxu0 %v2150_v5  ;;  %v2154_v56 = vpack.c.bf16 (!%p1770_p5), %v1549_v43, %v1548_v41 }
 0x7e9   : > { %v1284_v38 = vmul.f32 %v2597_v9, %v2597_v9  ;;  %2153 = vmatpush3.bf16.msra.mxu0 %v2150_v5 }
 0x7ea   : > { %v1289_v12 = vsel %vm582_vm2, %v1285_v10, 0.0  ;;  %2155 = vmatprep.subr.bf16.mxu0 (!%p1770_p5), %v2154_v56 }
 0x7eb   : > { %v1286_v39 = vsel %vm582_vm2, %v1284_v38, 0.0 }
 0x7ec   : > { %1287 = vadd.xlane.f32.xlu0 %v1286_v39 }
 0x7f0   : > { %1290 = vadd.xlane.f32.xlu0 %v1289_v12 }
 0x879   : > { %v1288_v50 = vpop.xlane.xlu0 %1287 }
 0x87a   : > { %v1292_v51 = vmul.f32 0.015625, %v1288_v50 }
 0x87c   : > { %v1294_v52 = vadd.f32 1e-05, %v1292_v51 }
 0x87d   : > { %v1291_v53 = vpop.xlane.xlu0 %1290 }
 0x87e   : > { %2257 = vrsqrt.f32 %v1294_v52  ;;  %v1293_v54 = vmul.f32 0.015625, %v1291_v53 }
 0x880   : > { %v1295_v55 = vadd.f32 1e-05, %v1293_v54 }
 0x882   : > { %2259 = vrsqrt.f32 %v1295_v55  ;;  %v1550_v55 = vld [vmem:[%s2701_s9 + $0x10] sm:$0xff] (!%p1770_p5) }
 0x888   : > { %v2258_v59 = vpop.eup %2257 }
 0x889   : > { %v1298_v60 = vmul.f32 %v2258_v59, %v2597_v9  ;;  %v1552_v59 = vld [vmem:[%s2701_s9 + $0x20] sm:$0xff] (!%p1770_p5) }
 0x88b   : > { %v1304_v62 = vmul.f32 %v1303_v58, %v1298_v60  ;;  %v1553_v60 = vld [vmem:[%s2701_s9 + $0x28] sm:$0xff] (!%p1770_p5) }
 0x88c   : > { %v2260_v0 = vpop.eup %2259 }
 0x88d   : > { %v1299_v1 = vmul.f32 %v2260_v0, %v2595_v8  ;;  %v1310_v6 = vadd.f32 %v1309_v61, %v1304_v62  ;;  %v1554_v62 = vld [vmem:[%s2701_s9 + $0x30] sm:$0xff] (!%p1770_p5)  ;;  %v1555_v0 = vld [vmem:[%s2701_s9 + $0x38] sm:$0xff] (!%p1770_p5) }
 0x88f   : > { %v1305_v2 = vmul.f32 %v1303_v58, %v1299_v1  ;;  %1969 = vmatprep.mubr.msk.f32.mxu1 %vm582_vm2, %v1310_v6  ;;  %v2158_v58 = vpack.c.bf16 (!%p1770_p5), %v1551_v57, %v1550_v55  ;;  %v2166_v1 = vpack.c.bf16 (!%p1770_p5), %v1555_v0, %v1554_v62 }
 0x891   : > { %v1311_v3 = vadd.f32 %v1309_v61, %v1305_v2  ;;  %v2162_v61 = vpack.c.bf16 (!%p1770_p5), %v1553_v60, %v1552_v59 }
 0x893   : > { %1970 = vmatmul.mubr.msk.f32.vlgmr.msra.gmra.mrb[12].mxu1 %vm582_vm2, %v1311_v3 }
 0x966   : > { %v1971_v9 = vpop.f32.mrb[12].mxu1 }
 0x967   : > { %v1402_v38 = vadd.f32 %v1971_v9, %v1323_v7  ;;  %v1396_v39 = vpop.f32.mrb[13].mxu1 }
 0x968   : > { %v1397_v8 = vadd.f32 %v1396_v39, %v1323_v7 }
 0x969   : > { %v1406_v12 = vmax.f32 %v1402_v38, 0.0 }
 0x96a   : > { %v1405_v10 = vmax.f32 %v1397_v8, 0.0 }
 0x96c   : > { %2004 = vmatprep.mubr.f32.mxu0 %v1405_v10 }
 0x96d   : > { %2005 = vmatmul.mubr.f32.vlgmr.msra.gmra.mrb[10].mxu0 %v1406_v12 }
 0x96e   : > { %2157 = vmatpush3.bf16.msra.mxu0 (!%p1770_p5), %v2154_v56 }
 0x96f   : > { %2159 = vmatprep.subr.bf16.mxu0 (!%p1770_p5), %v2158_v58 }
 0x972   : > { %2161 = vmatpush3.bf16.msra.mxu0 (!%p1770_p5), %v2158_v58 }
 0x973   : > { %2163 = vmatprep.subr.bf16.mxu0 (!%p1770_p5), %v2162_v61 }
 0x976   : > { %2165 = vmatpush3.bf16.msra.mxu0 (!%p1770_p5), %v2162_v61 }
 0x977   : > { %2167 = vmatprep.subr.bf16.mxu0 (!%p1770_p5), %v2166_v1 }
 0x97a   : > { %2169 = vmatpush3.bf16.msra.mxu0 (!%p1770_p5), %v2166_v1 }
 0xa40   : > { %v2006_v16 = vpop.f32.mrb[10].mxu0 }
 0xa41   : > { %v1499_v17 = vadd.f32 %v2006_v16, %v1426_v15  ;;  %v1493_v18 = vpop.f32.mrb[11].mxu0 }
 0xa42   : > { %v1494_v19 = vadd.f32 %v1493_v18, %v1426_v15 }
 0xa43   : > { %v1503_v20 = vadd.f32 %v1499_v17, %v1311_v3 }
 0xa44   : > { %v1502_v21 = vadd.f32 %v1494_v19, %v1310_v6  ;;  %v1771_v6 = vld [vmem:[%s2702_s10] ss:$0 sm:$0xff] (!%p1770_p5) }
 0xa45   : > { %v1507_v22 = vsel %vm582_vm2, %v1503_v20, 0.0 }
 0xa46   : > { %1508 = vadd.xlane.f32.xlu0 %v1507_v22  ;;  %v1504_v23 = vsel %vm582_vm2, %v1502_v21, 0.0 }
 0xa47   : > { %1505 = vadd.xlane.f32.xlu1 %v1504_v23 }
 0xad3   : > { %v1509_v63 = vpop.xlane.xlu0 %1508 }
 0xad4   : > { %v1511_v24 = vmul.f32 0.015625, %v1509_v63  ;;  %v1506_v25 = vpop.xlane.xlu1 %1505 }
 0xad5   : > { %v1510_v26 = vmul.f32 0.015625, %v1506_v25 }
 0xad6   : > { %v1513_v27 = vsub.f32 %v1503_v20, %v1511_v24 }
 0xad7   : > { %v1512_v28 = vsub.f32 %v1502_v21, %v1510_v26 }
 0xad8   : > { %v1515_v29 = vmul.f32 %v1513_v27, %v1513_v27 }
 0xad9   : > { %v1514_v30 = vmul.f32 %v1512_v28, %v1512_v28 }
 0xada   : > { %v1519_v31 = vsel %vm582_vm2, %v1515_v29, 0.0 }
 0xadb   : > { %1520 = vadd.xlane.f32.xlu0 %v1519_v31  ;;  %v1516_v32 = vsel %vm582_vm2, %v1514_v30, 0.0 }
 0xadc   : > { %1517 = vadd.xlane.f32.xlu1 %v1516_v32 }
 0xb68   : > { %v1521_v33 = vpop.xlane.xlu0 %1520 }
 0xb69   : > { %v1523_v34 = vmul.f32 0.015625, %v1521_v33  ;;  %v1518_v35 = vpop.xlane.xlu1 %1517 }
 0xb6a   : > { %v1522_v36 = vmul.f32 0.015625, %v1518_v35 }
 0xb6b   : > { %v1525_v37 = vadd.f32 1e-05, %v1523_v34 }
 0xb6c   : > { %v1524_v40 = vadd.f32 1e-05, %v1522_v36 }
 0xb6d   : > { %2261 = vrsqrt.f32 %v1525_v37 }
 0xb6e   : > { %2263 = vrsqrt.f32 %v1524_v40 }
 0xb77   : > { %v2262_v46 = vpop.eup %2261 }
 0xb78   : > { %v2264_v47 = vpop.eup %2263  ;;  %v1529_v49 = vmul.f32 %v2262_v46, %v1513_v27 }
 0xb79   : > { %v1528_v50 = vmul.f32 %v2264_v47, %v1512_v28  ;;  %1547 = sbr.rel (%p1770_p5) target bundleno = 3160 (0xc58), region = 72 }
 0xb7a   : > { %v1535_v51 = vmul.f32 %v1533_v45, %v1529_v49 }
 0xb7b   : > { %v1534_v52 = vmul.f32 %v1533_v45, %v1528_v50 }
 0xb7c   : > { %v1541_v53 = vadd.f32 %v1539_v48, %v1535_v51 }
 0xb7d   : > { %v1540_v54 = vadd.f32 %v1539_v48, %v1534_v52 }
 0xb7e   : > { %1543 = vst.msk [vmem:[#allocation2 + $0x8] sm:$0xff] %vm582_vm2, %v1541_v53 }
 0xb7f   : > { %1542 = vst.msk [vmem:[#allocation2] sm:$0xff] %vm582_vm2, %v1540_v54  ;;  %2023 = vmatprep.mubr.msk.f32.mxu0 (!%p1770_p5), %vm582_vm2, %v1540_v54 }
 0xb80   : > { %2024 = vmatmul.mubr.msk.f32.vlgmr.msra.gmra.mrb[0].mxu0 %vm582_vm2, %v1541_v53 }
 0xc53   : > { %v2025_v2 = vpop.f32.mrb[0].mxu0 }
 0xc54   : > { %v1641_v3 = vadd.f32 %v2025_v2, %v1771_v6  ;;  %v1635_v14 = vpop.f32.mrb[1].mxu0 }
 0xc55   : > { %v1636_v4 = vadd.f32 %v1771_v6, %v1635_v14 }
 0xc56   : > { %1645 = vst.msk [vmem:[%s2703_s11 + $0x8] sm:$0xff] %vm687_vm5, %v1641_v3 }
 0xc57   : > { %1644 = vst.msk [vmem:[%s2703_s11] sm:$0xff] %vm687_vm5, %v1636_v4 }
 0xc58 PF: > { %s21_s17 = sadd.s32 1, %s2271_s17  }
 0xc59   : > { %p18_p6 = scmp.ge.s32.totalorder %s21_s17, 4  }
 0xc5b   :  { %20 = sbr.rel (!%p18_p6) target bundleno = 1 (0x1), region = 110 }

</bundles_post_ra>
